<compile_context>
chip_gen: v7x
topology: tpu7x:2x2x1
jax: 0.10.0
libtpu: 0.0.40
codegen_flags: <defaults>
</compile_context>

<pallas_src>
import math

import jax
import jax.numpy as jnp
from jax.experimental import pallas as pl
from jax.experimental.pallas import tpu as pltpu

# ----------------------------- config --------------------------------------
B = 2            # batch
S = 8            # sequence length
INPUT_DIM = 4    # raw feature dim fed to tok_embedding (a Linear)
HID = 32         # hid_dim
N_HEADS = 4
HEAD_DIM = HID // N_HEADS
PF = 64          # pf_dim
N_LAYERS = 2
MAX_LEN = 100
EPS = 1e-5       # torch LayerNorm default
BS = B * S
NEG = -1.0e10    # matches torch masked_fill(-10000000000.0)

# rows of the packed per-layer vector buffer (each row pre-broadcast to BS sublanes)
_VROWS_PER_LAYER = 7                              # bo, ln1_g, ln1_b, b1, b2, ln2_g, ln2_b
_NVROWS = 1 + N_LAYERS * _VROWS_PER_LAYER         # row 0 = sqrt(HID)*b_emb + positional emb
_VW = max(HID, PF)                                # lane width of the packed vector buffer


# ----------------------------- kernel ---------------------------------------
def _layernorm(x, gamma, beta):
    mu = jnp.mean(x, axis=-1, keepdims=True)
    d = x - mu
    var = jnp.mean(d * d, axis=-1, keepdims=True)
    return d * jax.lax.rsqrt(var + EPS) * gamma + beta


def encoder_kernel(src_ref, bias_ref, w_emb_ref, wqkv_ref, bqkv_ref,
                   wo_ref, w1_ref, w2_ref, vec_ref, out_ref):
    """Fused embedding + all encoder layers, whole batch, single invocation.

    src_ref  : (BS, INPUT_DIM)                      runtime tokens (batch folded into rows)
    bias_ref : (BS, BS)                             additive attn bias (0 / -1e10), runtime
    w_emb_ref: (INPUT_DIM, HID)                     pre-scaled by sqrt(HID)
    wqkv_ref : (L, 3, N_HEADS, HID, HEAD_DIM)       per-head Q/K/V weights (Q / sqrt(hd))
    bqkv_ref : (L, 3, N_HEADS, BS, HEAD_DIM)        per-head Q/K/V biases, pre-broadcast
    wo_ref   : (L, N_HEADS, HEAD_DIM, HID)          Wo reshaped head-major
    w1_ref   : (L, HID, PF)
    w2_ref   : (L, PF, HID)
    vec_ref  : (_NVROWS, BS, _VW)                   packed row vectors, pre-broadcast
    out_ref  : (BS, HID)
    """
    # ---- token embedding (sqrt(HID) folded in; row 0 = b_emb*scale + pos) ----
    x = jnp.dot(src_ref[...], w_emb_ref[...],
                preferred_element_type=jnp.float32) + vec_ref[0, :, 0:HID]
    bias = bias_ref[...]                                              # (BS, BS)

    for li in range(N_LAYERS):                                        # static unroll
        base = 1 + li * _VROWS_PER_LAYER

        # ---- head-batched Q/K/V projections: born in (H, BS, HEAD_DIM) layout ----
        # x is replicated over the leading (untiled) head axis -> cheap vreg copies;
        # no transposes and no lane-axis slicing anywhere in attention.
        xb = jnp.broadcast_to(x, (N_HEADS, BS, HID))
        q = jnp.einsum('hbi,hio->hbo', xb, wqkv_ref[li, 0],
                       preferred_element_type=jnp.float32) + bqkv_ref[li, 0]
        k = jnp.einsum('hbi,hio->hbo', xb, wqkv_ref[li, 1],
                       preferred_element_type=jnp.float32) + bqkv_ref[li, 1]
        v = jnp.einsum('hbi,hio->hbo', xb, wqkv_ref[li, 2],
                       preferred_element_type=jnp.float32) + bqkv_ref[li, 2]

        # ---- all heads in one batched attention; ONE softmax per layer ----
        energy = jnp.einsum('hqd,hkd->hqk', q, k,
                            preferred_element_type=jnp.float32) + bias      # (H, BS, BS)
        m = jnp.max(energy, axis=-1, keepdims=True)
        e = jnp.exp(energy - m)              # masked / cross-batch entries -> exactly 0
        l = jnp.sum(e, axis=-1, keepdims=True)
        attn = e * pl.reciprocal(l, approx=False)   # exact; cost negligible at (H,BS,1)
        ctx = jnp.einsum('hqk,hkd->hqd', attn, v,
                         preferred_element_type=jnp.float32)                # (H, BS, hd)

        # ---- output projection: per-head contraction + head-sum (no lane concat) ----
        proj = jnp.einsum('hqd,hdo->hqo', ctx, wo_ref[li],
                          preferred_element_type=jnp.float32)               # (H, BS, HID)
        attn_out = jnp.sum(proj, axis=0) + vec_ref[base + 0, :, 0:HID]      # + bo

        # ---- residual + LayerNorm 1 ----
        x = _layernorm(x + attn_out,
                       vec_ref[base + 1, :, 0:HID], vec_ref[base + 2, :, 0:HID])

        # ---- position-wise feed-forward ----
        hdn = jnp.maximum(
            jnp.dot(x, w1_ref[li], preferred_element_type=jnp.float32)
            + vec_ref[base + 3, :, 0:PF], 0.0)
        ff = jnp.dot(hdn, w2_ref[li], preferred_element_type=jnp.float32) \
            + vec_ref[base + 4, :, 0:HID]

        # ---- residual + LayerNorm 2 ----
        x = _layernorm(x + ff,
                       vec_ref[base + 5, :, 0:HID], vec_ref[base + 6, :, 0:HID])

    out_ref[...] = x                                                  # single final store


# ----------------------------- wrappers --------------------------------------
_VMEM = pl.BlockSpec(memory_space=pltpu.MemorySpace.VMEM)


def pack_params(params):
    """One-time host-side packing: fold scales, build per-head weights, merge vectors."""
    scale = math.sqrt(HID)
    inv_s = 1.0 / math.sqrt(HEAD_DIM)

    def to_heads(w):                  # (HID, HID) -> (N_HEADS, HID, HEAD_DIM)
        return jnp.transpose(w.reshape(HID, N_HEADS, HEAD_DIM), (1, 0, 2))

    def head_bias(b):                 # (1, HID) -> (N_HEADS, BS, HEAD_DIM), pre-broadcast
        return jnp.broadcast_to(b.reshape(N_HEADS, 1, HEAD_DIM), (N_HEADS, BS, HEAD_DIM))

    def bcast_rows(v, width):         # (1, width) -> (BS, width)
        return jnp.broadcast_to(v.reshape(1, width), (BS, width))

    w_emb_s = params["w_emb"] * scale                                   # (INPUT_DIM, HID)
    add = params["b_emb"] * scale + params["pos_table"][:S]             # (S, HID)
    add_full = jnp.tile(add, (B, 1))                                    # (BS, HID)

    vecs = jnp.zeros((_NVROWS, BS, _VW), jnp.float32)
    vecs = vecs.at[0, :, :HID].set(add_full)

    wqkv_h, bqkv_h, wo_h, w1, w2 = [], [], [], [], []
    for li, lp in enumerate(params["layers"]):
        wqkv_h.append(jnp.stack([to_heads(lp["wq"] * inv_s),
                                 to_heads(lp["wk"]),
                                 to_heads(lp["wv"])]))                  # (3, H, HID, hd)
        bqkv_h.append(jnp.stack([head_bias(lp["bq"] * inv_s),
                                 head_bias(lp["bk"]),
                                 head_bias(lp["bv"])]))                 # (3, H, BS, hd)
        wo_h.append(lp["wo"].reshape(N_HEADS, HEAD_DIM, HID))           # head-major rows
        w1.append(lp["w1"])
        w2.append(lp["w2"])

        base = 1 + li * _VROWS_PER_LAYER
        vecs = vecs.at[base + 0, :, :HID].set(bcast_rows(lp["bo"], HID))
        vecs = vecs.at[base + 1, :, :HID].set(bcast_rows(lp["g1"], HID))
        vecs = vecs.at[base + 2, :, :HID].set(bcast_rows(lp["be1"], HID))
        vecs = vecs.at[base + 3, :, :PF].set(bcast_rows(lp["b1"], PF))
        vecs = vecs.at[base + 4, :, :HID].set(bcast_rows(lp["b2"], HID))
        vecs = vecs.at[base + 5, :, :HID].set(bcast_rows(lp["g2"], HID))
        vecs = vecs.at[base + 6, :, :HID].set(bcast_rows(lp["be2"], HID))

    return dict(w_emb=w_emb_s,
                wqkv_h=jnp.stack(wqkv_h), bqkv_h=jnp.stack(bqkv_h),
                wo_h=jnp.stack(wo_h), w1=jnp.stack(w1), w2=jnp.stack(w2),
                vecs=vecs)


def encoder_forward(src, src_mask, packed):
    src_flat = src.reshape(BS, INPUT_DIM)
    # additive attention bias: 0 keep, -1e10 for masked keys and cross-batch pairs
    key_bias = ((src_mask.astype(jnp.float32) - 1.0) * 1.0e10).reshape(1, BS)
    block = jnp.kron(jnp.eye(B, dtype=jnp.float32), jnp.ones((S, S), jnp.float32))
    bias2d = (block - 1.0) * 1.0e10 + key_bias                          # (BS, BS)

    # Grid-less, single-TensorCore launch: right call at B*S=16.
    # If B*S grows, add a leading "parallel" batch grid axis so the 2nd v7x TC is used.
    out = pl.pallas_call(
        encoder_kernel,
        out_shape=jax.ShapeDtypeStruct((BS, HID), jnp.float32),
        in_specs=[_VMEM] * 9,
        out_specs=_VMEM,
    )(src_flat, bias2d, packed["w_emb"], packed["wqkv_h"], packed["bqkv_h"],
      packed["wo_h"], packed["w1"], packed["w2"], packed["vecs"])
    return out.reshape(B, S, HID)


# ----------------------------- plain-JAX reference ---------------------------
def _ref_ln(x, g, b):
    mu = jnp.mean(x, axis=-1, keepdims=True)
    var = jnp.mean((x - mu) ** 2, axis=-1, keepdims=True)
    return (x - mu) / jnp.sqrt(var + EPS) * g + b


def reference_encoder(src, src_mask, params):
    x = (src @ params["w_emb"] + params["b_emb"]) * math.sqrt(HID) + params["pos_table"][:S]
    mask4 = src_mask[:, None, None, :].astype(jnp.float32)              # (B,1,1,S)
    for lp in params["layers"]:
        q = (x @ lp["wq"] + lp["bq"]).reshape(B, S, N_HEADS, HEAD_DIM).transpose(0, 2, 1, 3)
        k = (x @ lp["wk"] + lp["bk"]).reshape(B, S, N_HEADS, HEAD_DIM).transpose(0, 2, 1, 3)
        v = (x @ lp["wv"] + lp["bv"]).reshape(B, S, N_HEADS, HEAD_DIM).transpose(0, 2, 1, 3)
        energy = jnp.einsum("bhqd,bhkd->bhqk", q, k) / math.sqrt(HEAD_DIM)
        energy = jnp.where(mask4 == 0.0, NEG, energy)
        attn = jax.nn.softmax(energy, axis=-1)
        o = jnp.einsum("bhqk,bhkd->bhqd", attn, v).transpose(0, 2, 1, 3).reshape(B, S, HID)
        o = o @ lp["wo"] + lp["bo"]
        x = _ref_ln(x + o, lp["g1"], lp["be1"])
        f = jnp.maximum(x @ lp["w1"] + lp["b1"], 0.0) @ lp["w2"] + lp["b2"]
        x = _ref_ln(x + f, lp["g2"], lp["be2"])
    return x


# ----------------------------- param init ------------------------------------
def init_params(key):
    def lin(k, fan_in, fan_out):
        kw, kb = jax.random.split(k)
        lim = 1.0 / math.sqrt(fan_in)
        w = jax.random.uniform(kw, (fan_in, fan_out), jnp.float32, -lim, lim)
        b = jax.random.uniform(kb, (1, fan_out), jnp.float32, -lim, lim)
        return w, b

    keys = jax.random.split(key, 2 + N_LAYERS)
    w_emb, b_emb = lin(keys[0], INPUT_DIM, HID)
    pos_table = jax.random.normal(keys[1], (MAX_LEN, HID), jnp.float32)
    layers = []
    for li in range(N_LAYERS):
        ks = jax.random.split(keys[2 + li], 6)
        wq, bq = lin(ks[0], HID, HID)
        wk, bk = lin(ks[1], HID, HID)
        wv, bv = lin(ks[2], HID, HID)
        wo, bo = lin(ks[3], HID, HID)
        w1, b1 = lin(ks[4], HID, PF)
        w2, b2 = lin(ks[5], PF, HID)
        layers.append(dict(
            wq=wq, bq=bq, wk=wk, bk=bk, wv=wv, bv=bv, wo=wo, bo=bo,
            g1=jnp.ones((1, HID), jnp.float32), be1=jnp.zeros((1, HID), jnp.float32),
            w1=w1, b1=b1, w2=w2, b2=b2,
            g2=jnp.ones((1, HID), jnp.float32), be2=jnp.zeros((1, HID), jnp.float32),
        ))
    return dict(w_emb=w_emb, b_emb=b_emb, pos_table=pos_table, layers=layers)


# ----------------------------- main -------------------------------------------
if __name__ == "__main__":
    key = jax.random.PRNGKey(0)
    k_src, k_par = jax.random.split(key)
    src = jax.random.normal(k_src, (B, S, INPUT_DIM), jnp.float32)
    # padding-style mask: batch 1 has its last 2 key positions masked out
    src_mask = jnp.ones((B, S), jnp.float32).at[1, 6:].set(0.0)
    params = init_params(k_par)
    packed = pack_params(params)

    fwd = jax.jit(encoder_forward)
    out = jax.block_until_ready(fwd(src, src_mask, packed))

    ref = reference_encoder(src, src_mask, params)
    assert out.shape == (B, S, HID)
    err = float(jnp.max(jnp.abs(out - ref)))
    assert jnp.allclose(out, ref, rtol=1e-3, atol=1e-3), f"max abs diff {err}"
    print("KERNEL_OK")
</pallas_src>

<mosaic_0001>
module attributes {stable_mosaic.version = 11 : i64} {
  func.func @encoder_kernel(%arg0: memref<16x4xf32, #tpu.memory_space<vmem>>, %arg1: memref<16x16xf32, #tpu.memory_space<vmem>>, %arg2: memref<4x32xf32, #tpu.memory_space<vmem>>, %arg3: memref<2x3x4x32x8xf32, #tpu.memory_space<vmem>>, %arg4: memref<2x3x4x16x8xf32, #tpu.memory_space<vmem>>, %arg5: memref<2x4x8x32xf32, #tpu.memory_space<vmem>>, %arg6: memref<2x32x64xf32, #tpu.memory_space<vmem>>, %arg7: memref<2x64x32xf32, #tpu.memory_space<vmem>>, %arg8: memref<15x16x64xf32, #tpu.memory_space<vmem>>, %arg9: memref<16x32xf32, #tpu.memory_space<vmem>>) attributes {dimension_semantics = [], scalar_prefetch = 0 : i64, scratch_operands = 0 : i64, tpu.core_type = #tpu.core_type<tc>} {
    %c0 = arith.constant 0 : index
    %c0_0 = arith.constant 0 : index
    %0 = vector.load %arg0[%c0, %c0_0] : memref<16x4xf32, #tpu.memory_space<vmem>>, vector<16x4xf32>
    %c0_1 = arith.constant 0 : index
    %c0_2 = arith.constant 0 : index
    %1 = vector.load %arg2[%c0_1, %c0_2] : memref<4x32xf32, #tpu.memory_space<vmem>>, vector<4x32xf32>
    %cst = arith.constant dense<0.000000e+00> : vector<16x32xf32>
    %2 = tpu.matmul %0, %1, %cst {dimension_numbers = #tpu.dot_dimension_numbers<[1], [0], [0], [1], [0, 0, 1, 1], [], []>} : vector<16x4xf32>, vector<4x32xf32>, vector<16x32xf32> -> vector<16x32xf32>
    %c0_3 = arith.constant 0 : index
    %c0_4 = arith.constant 0 : index
    %c0_5 = arith.constant 0 : index
    %3 = vector.load %arg8[%c0_3, %c0_4, %c0_5] : memref<15x16x64xf32, #tpu.memory_space<vmem>>, vector<1x16x32xf32>
    %4 = vector.shape_cast %3 : vector<1x16x32xf32> to vector<16x32xf32>
    %5 = arith.addf %2, %4 : vector<16x32xf32>
    %c0_6 = arith.constant 0 : index
    %c0_7 = arith.constant 0 : index
    %6 = vector.load %arg1[%c0_6, %c0_7] : memref<16x16xf32, #tpu.memory_space<vmem>>, vector<16x16xf32>
    %7 = vector.shape_cast %5 : vector<16x32xf32> to vector<1x16x32xf32>
    %8 = vector.broadcast %7 : vector<1x16x32xf32> to vector<4x16x32xf32>
    %c0_8 = arith.constant 0 : index
    %c0_9 = arith.constant 0 : index
    %c0_10 = arith.constant 0 : index
    %c0_11 = arith.constant 0 : index
    %c0_12 = arith.constant 0 : index
    %9 = vector.load %arg3[%c0_8, %c0_9, %c0_10, %c0_11, %c0_12] : memref<2x3x4x32x8xf32, #tpu.memory_space<vmem>>, vector<1x1x4x32x8xf32>
    %10 = vector.shape_cast %9 : vector<1x1x4x32x8xf32> to vector<4x32x8xf32>
    "tpu.trace_start"() <{level = 10 : i32, message = "hbi,hio->hbo"}> : () -> ()
    %cst_13 = arith.constant dense<0.000000e+00> : vector<4x16x8xf32>
    %11 = tpu.matmul %8, %10, %cst_13 {dimension_numbers = #tpu.dot_dimension_numbers<[2], [1], [1], [2], [0, 0, 0, 1, 1, 2], [0], [0]>} : vector<4x16x32xf32>, vector<4x32x8xf32>, vector<4x16x8xf32> -> vector<4x16x8xf32>
    "tpu.trace_stop"() : () -> ()
    %c0_14 = arith.constant 0 : index
    %c0_15 = arith.constant 0 : index
    %c0_16 = arith.constant 0 : index
    %c0_17 = arith.constant 0 : index
    %c0_18 = arith.constant 0 : index
    %12 = vector.load %arg4[%c0_14, %c0_15, %c0_16, %c0_17, %c0_18] : memref<2x3x4x16x8xf32, #tpu.memory_space<vmem>>, vector<1x1x4x16x8xf32>
    %13 = vector.shape_cast %12 : vector<1x1x4x16x8xf32> to vector<4x16x8xf32>
    %14 = arith.addf %11, %13 : vector<4x16x8xf32>
    %c0_19 = arith.constant 0 : index
    %c1 = arith.constant 1 : index
    %c0_20 = arith.constant 0 : index
    %c0_21 = arith.constant 0 : index
    %c0_22 = arith.constant 0 : index
    %15 = vector.load %arg3[%c0_19, %c1, %c0_20, %c0_21, %c0_22] : memref<2x3x4x32x8xf32, #tpu.memory_space<vmem>>, vector<1x1x4x32x8xf32>
    %16 = vector.shape_cast %15 : vector<1x1x4x32x8xf32> to vector<4x32x8xf32>
    "tpu.trace_start"() <{level = 10 : i32, message = "hbi,hio->hbo"}> : () -> ()
    %cst_23 = arith.constant dense<0.000000e+00> : vector<4x16x8xf32>
    %17 = tpu.matmul %8, %16, %cst_23 {dimension_numbers = #tpu.dot_dimension_numbers<[2], [1], [1], [2], [0, 0, 0, 1, 1, 2], [0], [0]>} : vector<4x16x32xf32>, vector<4x32x8xf32>, vector<4x16x8xf32> -> vector<4x16x8xf32>
    "tpu.trace_stop"() : () -> ()
    %c0_24 = arith.constant 0 : index
    %c1_25 = arith.constant 1 : index
    %c0_26 = arith.constant 0 : index
    %c0_27 = arith.constant 0 : index
    %c0_28 = arith.constant 0 : index
    %18 = vector.load %arg4[%c0_24, %c1_25, %c0_26, %c0_27, %c0_28] : memref<2x3x4x16x8xf32, #tpu.memory_space<vmem>>, vector<1x1x4x16x8xf32>
    %19 = vector.shape_cast %18 : vector<1x1x4x16x8xf32> to vector<4x16x8xf32>
    %20 = arith.addf %17, %19 : vector<4x16x8xf32>
    %c0_29 = arith.constant 0 : index
    %c2 = arith.constant 2 : index
    %c0_30 = arith.constant 0 : index
    %c0_31 = arith.constant 0 : index
    %c0_32 = arith.constant 0 : index
    %21 = vector.load %arg3[%c0_29, %c2, %c0_30, %c0_31, %c0_32] : memref<2x3x4x32x8xf32, #tpu.memory_space<vmem>>, vector<1x1x4x32x8xf32>
    %22 = vector.shape_cast %21 : vector<1x1x4x32x8xf32> to vector<4x32x8xf32>
    "tpu.trace_start"() <{level = 10 : i32, message = "hbi,hio->hbo"}> : () -> ()
    %cst_33 = arith.constant dense<0.000000e+00> : vector<4x16x8xf32>
    %23 = tpu.matmul %8, %22, %cst_33 {dimension_numbers = #tpu.dot_dimension_numbers<[2], [1], [1], [2], [0, 0, 0, 1, 1, 2], [0], [0]>} : vector<4x16x32xf32>, vector<4x32x8xf32>, vector<4x16x8xf32> -> vector<4x16x8xf32>
    "tpu.trace_stop"() : () -> ()
    %c0_34 = arith.constant 0 : index
    %c2_35 = arith.constant 2 : index
    %c0_36 = arith.constant 0 : index
    %c0_37 = arith.constant 0 : index
    %c0_38 = arith.constant 0 : index
    %24 = vector.load %arg4[%c0_34, %c2_35, %c0_36, %c0_37, %c0_38] : memref<2x3x4x16x8xf32, #tpu.memory_space<vmem>>, vector<1x1x4x16x8xf32>
    %25 = vector.shape_cast %24 : vector<1x1x4x16x8xf32> to vector<4x16x8xf32>
    %26 = arith.addf %23, %25 : vector<4x16x8xf32>
    "tpu.trace_start"() <{level = 10 : i32, message = "hqd,hkd->hqk"}> : () -> ()
    %cst_39 = arith.constant dense<0.000000e+00> : vector<4x16x16xf32>
    %27 = tpu.matmul %14, %20, %cst_39 {dimension_numbers = #tpu.dot_dimension_numbers<[2], [2], [1], [1], [0, 0, 0, 1, 1, 1], [0], [0]>} : vector<4x16x8xf32>, vector<4x16x8xf32>, vector<4x16x16xf32> -> vector<4x16x16xf32>
    "tpu.trace_stop"() : () -> ()
    %28 = vector.shape_cast %6 : vector<16x16xf32> to vector<1x16x16xf32>
    %29 = vector.broadcast %28 : vector<1x16x16xf32> to vector<4x16x16xf32>
    %30 = arith.addf %27, %29 : vector<4x16x16xf32>
    %cst_40 = arith.constant dense<0xFF800000> : vector<4x16xf32>
    %31 = vector.multi_reduction <maximumf>, %30, %cst_40 [2] : vector<4x16x16xf32> to vector<4x16xf32>
    %32 = vector.shape_cast %31 : vector<4x16xf32> to vector<4x16x1xf32>
    %33 = vector.broadcast %32 : vector<4x16x1xf32> to vector<4x16x16xf32>
    %34 = arith.subf %30, %33 : vector<4x16x16xf32>
    %35 = math.exp %34 : vector<4x16x16xf32>
    %cst_41 = arith.constant dense<0.000000e+00> : vector<4x16xf32>
    %36 = vector.multi_reduction <add>, %35, %cst_41 [2] : vector<4x16x16xf32> to vector<4x16xf32>
    %37 = vector.shape_cast %36 : vector<4x16xf32> to vector<4x16x1xf32>
    %38 = tpu.reciprocal %37 : vector<4x16x1xf32> -> vector<4x16x1xf32>
    %39 = vector.broadcast %38 : vector<4x16x1xf32> to vector<4x16x16xf32>
    %40 = arith.mulf %35, %39 : vector<4x16x16xf32>
    "tpu.trace_start"() <{level = 10 : i32, message = "hqk,hkd->hqd"}> : () -> ()
    %cst_42 = arith.constant dense<0.000000e+00> : vector<4x16x8xf32>
    %41 = tpu.matmul %40, %26, %cst_42 {dimension_numbers = #tpu.dot_dimension_numbers<[2], [1], [1], [2], [0, 0, 0, 1, 1, 2], [0], [0]>} : vector<4x16x16xf32>, vector<4x16x8xf32>, vector<4x16x8xf32> -> vector<4x16x8xf32>
    "tpu.trace_stop"() : () -> ()
    %c0_43 = arith.constant 0 : index
    %c0_44 = arith.constant 0 : index
    %c0_45 = arith.constant 0 : index
    %c0_46 = arith.constant 0 : index
    %42 = vector.load %arg5[%c0_43, %c0_44, %c0_45, %c0_46] : memref<2x4x8x32xf32, #tpu.memory_space<vmem>>, vector<1x4x8x32xf32>
    %43 = vector.shape_cast %42 : vector<1x4x8x32xf32> to vector<4x8x32xf32>
    "tpu.trace_start"() <{level = 10 : i32, message = "hqd,hdo->hqo"}> : () -> ()
    %cst_47 = arith.constant dense<0.000000e+00> : vector<4x16x32xf32>
    %44 = tpu.matmul %41, %43, %cst_47 {dimension_numbers = #tpu.dot_dimension_numbers<[2], [1], [1], [2], [0, 0, 0, 1, 1, 2], [0], [0]>} : vector<4x16x8xf32>, vector<4x8x32xf32>, vector<4x16x32xf32> -> vector<4x16x32xf32>
    "tpu.trace_stop"() : () -> ()
    %cst_48 = arith.constant dense<0.000000e+00> : vector<16x32xf32>
    %45 = vector.multi_reduction <add>, %44, %cst_48 [0] : vector<4x16x32xf32> to vector<16x32xf32>
    %c1_49 = arith.constant 1 : index
    %c0_50 = arith.constant 0 : index
    %c0_51 = arith.constant 0 : index
    %46 = vector.load %arg8[%c1_49, %c0_50, %c0_51] : memref<15x16x64xf32, #tpu.memory_space<vmem>>, vector<1x16x32xf32>
    %47 = vector.shape_cast %46 : vector<1x16x32xf32> to vector<16x32xf32>
    %48 = arith.addf %45, %47 : vector<16x32xf32>
    %49 = arith.addf %5, %48 : vector<16x32xf32>
    %c2_52 = arith.constant 2 : index
    %c0_53 = arith.constant 0 : index
    %c0_54 = arith.constant 0 : index
    %50 = vector.load %arg8[%c2_52, %c0_53, %c0_54] : memref<15x16x64xf32, #tpu.memory_space<vmem>>, vector<1x16x32xf32>
    %51 = vector.shape_cast %50 : vector<1x16x32xf32> to vector<16x32xf32>
    %c3 = arith.constant 3 : index
    %c0_55 = arith.constant 0 : index
    %c0_56 = arith.constant 0 : index
    %52 = vector.load %arg8[%c3, %c0_55, %c0_56] : memref<15x16x64xf32, #tpu.memory_space<vmem>>, vector<1x16x32xf32>
    %53 = vector.shape_cast %52 : vector<1x16x32xf32> to vector<16x32xf32>
    %cst_57 = arith.constant dense<0.000000e+00> : vector<16xf32>
    %54 = vector.multi_reduction <add>, %49, %cst_57 [1] : vector<16x32xf32> to vector<16xf32>
    %55 = vector.shape_cast %54 : vector<16xf32> to vector<16x1xf32>
    %cst_58 = arith.constant 3.200000e+01 : f32
    %56 = vector.broadcast %cst_58 : f32 to vector<16x1xf32>
    %57 = arith.divf %55, %56 : vector<16x1xf32>
    %58 = vector.broadcast %57 : vector<16x1xf32> to vector<16x32xf32>
    %59 = arith.subf %49, %58 : vector<16x32xf32>
    %60 = arith.mulf %59, %59 : vector<16x32xf32>
    %cst_59 = arith.constant dense<0.000000e+00> : vector<16xf32>
    %61 = vector.multi_reduction <add>, %60, %cst_59 [1] : vector<16x32xf32> to vector<16xf32>
    %62 = vector.shape_cast %61 : vector<16xf32> to vector<16x1xf32>
    %cst_60 = arith.constant 3.200000e+01 : f32
    %63 = vector.broadcast %cst_60 : f32 to vector<16x1xf32>
    %64 = arith.divf %62, %63 : vector<16x1xf32>
    %cst_61 = arith.constant 9.99999974E-6 : f32
    %65 = vector.broadcast %cst_61 : f32 to vector<16x1xf32>
    %66 = arith.addf %64, %65 : vector<16x1xf32>
    %67 = math.rsqrt %66 : vector<16x1xf32>
    %68 = vector.broadcast %67 : vector<16x1xf32> to vector<16x32xf32>
    %69 = arith.mulf %59, %68 : vector<16x32xf32>
    %70 = arith.mulf %69, %51 : vector<16x32xf32>
    %71 = arith.addf %70, %53 : vector<16x32xf32>
    %c0_62 = arith.constant 0 : index
    %c0_63 = arith.constant 0 : index
    %c0_64 = arith.constant 0 : index
    %72 = vector.load %arg6[%c0_62, %c0_63, %c0_64] : memref<2x32x64xf32, #tpu.memory_space<vmem>>, vector<1x32x64xf32>
    %73 = vector.shape_cast %72 : vector<1x32x64xf32> to vector<32x64xf32>
    %cst_65 = arith.constant dense<0.000000e+00> : vector<16x64xf32>
    %74 = tpu.matmul %71, %73, %cst_65 {dimension_numbers = #tpu.dot_dimension_numbers<[1], [0], [0], [1], [0, 0, 1, 1], [], []>} : vector<16x32xf32>, vector<32x64xf32>, vector<16x64xf32> -> vector<16x64xf32>
    %c4 = arith.constant 4 : index
    %c0_66 = arith.constant 0 : index
    %c0_67 = arith.constant 0 : index
    %75 = vector.load %arg8[%c4, %c0_66, %c0_67] : memref<15x16x64xf32, #tpu.memory_space<vmem>>, vector<1x16x64xf32>
    %76 = vector.shape_cast %75 : vector<1x16x64xf32> to vector<16x64xf32>
    %77 = arith.addf %74, %76 : vector<16x64xf32>
    %cst_68 = arith.constant 0.000000e+00 : f32
    %78 = vector.broadcast %cst_68 : f32 to vector<16x64xf32>
    %79 = arith.maximumf %77, %78 : vector<16x64xf32>
    %c0_69 = arith.constant 0 : index
    %c0_70 = arith.constant 0 : index
    %c0_71 = arith.constant 0 : index
    %80 = vector.load %arg7[%c0_69, %c0_70, %c0_71] : memref<2x64x32xf32, #tpu.memory_space<vmem>>, vector<1x64x32xf32>
    %81 = vector.shape_cast %80 : vector<1x64x32xf32> to vector<64x32xf32>
    %cst_72 = arith.constant dense<0.000000e+00> : vector<16x32xf32>
    %82 = tpu.matmul %79, %81, %cst_72 {dimension_numbers = #tpu.dot_dimension_numbers<[1], [0], [0], [1], [0, 0, 1, 1], [], []>} : vector<16x64xf32>, vector<64x32xf32>, vector<16x32xf32> -> vector<16x32xf32>
    %c5 = arith.constant 5 : index
    %c0_73 = arith.constant 0 : index
    %c0_74 = arith.constant 0 : index
    %83 = vector.load %arg8[%c5, %c0_73, %c0_74] : memref<15x16x64xf32, #tpu.memory_space<vmem>>, vector<1x16x32xf32>
    %84 = vector.shape_cast %83 : vector<1x16x32xf32> to vector<16x32xf32>
    %85 = arith.addf %82, %84 : vector<16x32xf32>
    %86 = arith.addf %71, %85 : vector<16x32xf32>
    %c6 = arith.constant 6 : index
    %c0_75 = arith.constant 0 : index
    %c0_76 = arith.constant 0 : index
    %87 = vector.load %arg8[%c6, %c0_75, %c0_76] : memref<15x16x64xf32, #tpu.memory_space<vmem>>, vector<1x16x32xf32>
    %88 = vector.shape_cast %87 : vector<1x16x32xf32> to vector<16x32xf32>
    %c7 = arith.constant 7 : index
    %c0_77 = arith.constant 0 : index
    %c0_78 = arith.constant 0 : index
    %89 = vector.load %arg8[%c7, %c0_77, %c0_78] : memref<15x16x64xf32, #tpu.memory_space<vmem>>, vector<1x16x32xf32>
    %90 = vector.shape_cast %89 : vector<1x16x32xf32> to vector<16x32xf32>
    %cst_79 = arith.constant dense<0.000000e+00> : vector<16xf32>
    %91 = vector.multi_reduction <add>, %86, %cst_79 [1] : vector<16x32xf32> to vector<16xf32>
    %92 = vector.shape_cast %91 : vector<16xf32> to vector<16x1xf32>
    %cst_80 = arith.constant 3.200000e+01 : f32
    %93 = vector.broadcast %cst_80 : f32 to vector<16x1xf32>
    %94 = arith.divf %92, %93 : vector<16x1xf32>
    %95 = vector.broadcast %94 : vector<16x1xf32> to vector<16x32xf32>
    %96 = arith.subf %86, %95 : vector<16x32xf32>
    %97 = arith.mulf %96, %96 : vector<16x32xf32>
    %cst_81 = arith.constant dense<0.000000e+00> : vector<16xf32>
    %98 = vector.multi_reduction <add>, %97, %cst_81 [1] : vector<16x32xf32> to vector<16xf32>
    %99 = vector.shape_cast %98 : vector<16xf32> to vector<16x1xf32>
    %cst_82 = arith.constant 3.200000e+01 : f32
    %100 = vector.broadcast %cst_82 : f32 to vector<16x1xf32>
    %101 = arith.divf %99, %100 : vector<16x1xf32>
    %cst_83 = arith.constant 9.99999974E-6 : f32
    %102 = vector.broadcast %cst_83 : f32 to vector<16x1xf32>
    %103 = arith.addf %101, %102 : vector<16x1xf32>
    %104 = math.rsqrt %103 : vector<16x1xf32>
    %105 = vector.broadcast %104 : vector<16x1xf32> to vector<16x32xf32>
    %106 = arith.mulf %96, %105 : vector<16x32xf32>
    %107 = arith.mulf %106, %88 : vector<16x32xf32>
    %108 = arith.addf %107, %90 : vector<16x32xf32>
    %109 = vector.shape_cast %108 : vector<16x32xf32> to vector<1x16x32xf32>
    %110 = vector.broadcast %109 : vector<1x16x32xf32> to vector<4x16x32xf32>
    %c1_84 = arith.constant 1 : index
    %c0_85 = arith.constant 0 : index
    %c0_86 = arith.constant 0 : index
    %c0_87 = arith.constant 0 : index
    %c0_88 = arith.constant 0 : index
    %111 = vector.load %arg3[%c1_84, %c0_85, %c0_86, %c0_87, %c0_88] : memref<2x3x4x32x8xf32, #tpu.memory_space<vmem>>, vector<1x1x4x32x8xf32>
    %112 = vector.shape_cast %111 : vector<1x1x4x32x8xf32> to vector<4x32x8xf32>
    "tpu.trace_start"() <{level = 10 : i32, message = "hbi,hio->hbo"}> : () -> ()
    %cst_89 = arith.constant dense<0.000000e+00> : vector<4x16x8xf32>
    %113 = tpu.matmul %110, %112, %cst_89 {dimension_numbers = #tpu.dot_dimension_numbers<[2], [1], [1], [2], [0, 0, 0, 1, 1, 2], [0], [0]>} : vector<4x16x32xf32>, vector<4x32x8xf32>, vector<4x16x8xf32> -> vector<4x16x8xf32>
    "tpu.trace_stop"() : () -> ()
    %c1_90 = arith.constant 1 : index
    %c0_91 = arith.constant 0 : index
    %c0_92 = arith.constant 0 : index
    %c0_93 = arith.constant 0 : index
    %c0_94 = arith.constant 0 : index
    %114 = vector.load %arg4[%c1_90, %c0_91, %c0_92, %c0_93, %c0_94] : memref<2x3x4x16x8xf32, #tpu.memory_space<vmem>>, vector<1x1x4x16x8xf32>
    %115 = vector.shape_cast %114 : vector<1x1x4x16x8xf32> to vector<4x16x8xf32>
    %116 = arith.addf %113, %115 : vector<4x16x8xf32>
    %c1_95 = arith.constant 1 : index
    %c1_96 = arith.constant 1 : index
    %c0_97 = arith.constant 0 : index
    %c0_98 = arith.constant 0 : index
    %c0_99 = arith.constant 0 : index
    %117 = vector.load %arg3[%c1_95, %c1_96, %c0_97, %c0_98, %c0_99] : memref<2x3x4x32x8xf32, #tpu.memory_space<vmem>>, vector<1x1x4x32x8xf32>
    %118 = vector.shape_cast %117 : vector<1x1x4x32x8xf32> to vector<4x32x8xf32>
    "tpu.trace_start"() <{level = 10 : i32, message = "hbi,hio->hbo"}> : () -> ()
    %cst_100 = arith.constant dense<0.000000e+00> : vector<4x16x8xf32>
    %119 = tpu.matmul %110, %118, %cst_100 {dimension_numbers = #tpu.dot_dimension_numbers<[2], [1], [1], [2], [0, 0, 0, 1, 1, 2], [0], [0]>} : vector<4x16x32xf32>, vector<4x32x8xf32>, vector<4x16x8xf32> -> vector<4x16x8xf32>
    "tpu.trace_stop"() : () -> ()
    %c1_101 = arith.constant 1 : index
    %c1_102 = arith.constant 1 : index
    %c0_103 = arith.constant 0 : index
    %c0_104 = arith.constant 0 : index
    %c0_105 = arith.constant 0 : index
    %120 = vector.load %arg4[%c1_101, %c1_102, %c0_103, %c0_104, %c0_105] : memref<2x3x4x16x8xf32, #tpu.memory_space<vmem>>, vector<1x1x4x16x8xf32>
    %121 = vector.shape_cast %120 : vector<1x1x4x16x8xf32> to vector<4x16x8xf32>
    %122 = arith.addf %119, %121 : vector<4x16x8xf32>
    %c1_106 = arith.constant 1 : index
    %c2_107 = arith.constant 2 : index
    %c0_108 = arith.constant 0 : index
    %c0_109 = arith.constant 0 : index
    %c0_110 = arith.constant 0 : index
    %123 = vector.load %arg3[%c1_106, %c2_107, %c0_108, %c0_109, %c0_110] : memref<2x3x4x32x8xf32, #tpu.memory_space<vmem>>, vector<1x1x4x32x8xf32>
    %124 = vector.shape_cast %123 : vector<1x1x4x32x8xf32> to vector<4x32x8xf32>
    "tpu.trace_start"() <{level = 10 : i32, message = "hbi,hio->hbo"}> : () -> ()
    %cst_111 = arith.constant dense<0.000000e+00> : vector<4x16x8xf32>
    %125 = tpu.matmul %110, %124, %cst_111 {dimension_numbers = #tpu.dot_dimension_numbers<[2], [1], [1], [2], [0, 0, 0, 1, 1, 2], [0], [0]>} : vector<4x16x32xf32>, vector<4x32x8xf32>, vector<4x16x8xf32> -> vector<4x16x8xf32>
    "tpu.trace_stop"() : () -> ()
    %c1_112 = arith.constant 1 : index
    %c2_113 = arith.constant 2 : index
    %c0_114 = arith.constant 0 : index
    %c0_115 = arith.constant 0 : index
    %c0_116 = arith.constant 0 : index
    %126 = vector.load %arg4[%c1_112, %c2_113, %c0_114, %c0_115, %c0_116] : memref<2x3x4x16x8xf32, #tpu.memory_space<vmem>>, vector<1x1x4x16x8xf32>
    %127 = vector.shape_cast %126 : vector<1x1x4x16x8xf32> to vector<4x16x8xf32>
    %128 = arith.addf %125, %127 : vector<4x16x8xf32>
    "tpu.trace_start"() <{level = 10 : i32, message = "hqd,hkd->hqk"}> : () -> ()
    %cst_117 = arith.constant dense<0.000000e+00> : vector<4x16x16xf32>
    %129 = tpu.matmul %116, %122, %cst_117 {dimension_numbers = #tpu.dot_dimension_numbers<[2], [2], [1], [1], [0, 0, 0, 1, 1, 1], [0], [0]>} : vector<4x16x8xf32>, vector<4x16x8xf32>, vector<4x16x16xf32> -> vector<4x16x16xf32>
    "tpu.trace_stop"() : () -> ()
    %130 = vector.shape_cast %6 : vector<16x16xf32> to vector<1x16x16xf32>
    %131 = vector.broadcast %130 : vector<1x16x16xf32> to vector<4x16x16xf32>
    %132 = arith.addf %129, %131 : vector<4x16x16xf32>
    %cst_118 = arith.constant dense<0xFF800000> : vector<4x16xf32>
    %133 = vector.multi_reduction <maximumf>, %132, %cst_118 [2] : vector<4x16x16xf32> to vector<4x16xf32>
    %134 = vector.shape_cast %133 : vector<4x16xf32> to vector<4x16x1xf32>
    %135 = vector.broadcast %134 : vector<4x16x1xf32> to vector<4x16x16xf32>
    %136 = arith.subf %132, %135 : vector<4x16x16xf32>
    %137 = math.exp %136 : vector<4x16x16xf32>
    %cst_119 = arith.constant dense<0.000000e+00> : vector<4x16xf32>
    %138 = vector.multi_reduction <add>, %137, %cst_119 [2] : vector<4x16x16xf32> to vector<4x16xf32>
    %139 = vector.shape_cast %138 : vector<4x16xf32> to vector<4x16x1xf32>
    %140 = tpu.reciprocal %139 : vector<4x16x1xf32> -> vector<4x16x1xf32>
    %141 = vector.broadcast %140 : vector<4x16x1xf32> to vector<4x16x16xf32>
    %142 = arith.mulf %137, %141 : vector<4x16x16xf32>
    "tpu.trace_start"() <{level = 10 : i32, message = "hqk,hkd->hqd"}> : () -> ()
    %cst_120 = arith.constant dense<0.000000e+00> : vector<4x16x8xf32>
    %143 = tpu.matmul %142, %128, %cst_120 {dimension_numbers = #tpu.dot_dimension_numbers<[2], [1], [1], [2], [0, 0, 0, 1, 1, 2], [0], [0]>} : vector<4x16x16xf32>, vector<4x16x8xf32>, vector<4x16x8xf32> -> vector<4x16x8xf32>
    "tpu.trace_stop"() : () -> ()
    %c1_121 = arith.constant 1 : index
    %c0_122 = arith.constant 0 : index
    %c0_123 = arith.constant 0 : index
    %c0_124 = arith.constant 0 : index
    %144 = vector.load %arg5[%c1_121, %c0_122, %c0_123, %c0_124] : memref<2x4x8x32xf32, #tpu.memory_space<vmem>>, vector<1x4x8x32xf32>
    %145 = vector.shape_cast %144 : vector<1x4x8x32xf32> to vector<4x8x32xf32>
    "tpu.trace_start"() <{level = 10 : i32, message = "hqd,hdo->hqo"}> : () -> ()
    %cst_125 = arith.constant dense<0.000000e+00> : vector<4x16x32xf32>
    %146 = tpu.matmul %143, %145, %cst_125 {dimension_numbers = #tpu.dot_dimension_numbers<[2], [1], [1], [2], [0, 0, 0, 1, 1, 2], [0], [0]>} : vector<4x16x8xf32>, vector<4x8x32xf32>, vector<4x16x32xf32> -> vector<4x16x32xf32>
    "tpu.trace_stop"() : () -> ()
    %cst_126 = arith.constant dense<0.000000e+00> : vector<16x32xf32>
    %147 = vector.multi_reduction <add>, %146, %cst_126 [0] : vector<4x16x32xf32> to vector<16x32xf32>
    %c8 = arith.constant 8 : index
    %c0_127 = arith.constant 0 : index
    %c0_128 = arith.constant 0 : index
    %148 = vector.load %arg8[%c8, %c0_127, %c0_128] : memref<15x16x64xf32, #tpu.memory_space<vmem>>, vector<1x16x32xf32>
    %149 = vector.shape_cast %148 : vector<1x16x32xf32> to vector<16x32xf32>
    %150 = arith.addf %147, %149 : vector<16x32xf32>
    %151 = arith.addf %108, %150 : vector<16x32xf32>
    %c9 = arith.constant 9 : index
    %c0_129 = arith.constant 0 : index
    %c0_130 = arith.constant 0 : index
    %152 = vector.load %arg8[%c9, %c0_129, %c0_130] : memref<15x16x64xf32, #tpu.memory_space<vmem>>, vector<1x16x32xf32>
    %153 = vector.shape_cast %152 : vector<1x16x32xf32> to vector<16x32xf32>
    %c10 = arith.constant 10 : index
    %c0_131 = arith.constant 0 : index
    %c0_132 = arith.constant 0 : index
    %154 = vector.load %arg8[%c10, %c0_131, %c0_132] : memref<15x16x64xf32, #tpu.memory_space<vmem>>, vector<1x16x32xf32>
    %155 = vector.shape_cast %154 : vector<1x16x32xf32> to vector<16x32xf32>
    %cst_133 = arith.constant dense<0.000000e+00> : vector<16xf32>
    %156 = vector.multi_reduction <add>, %151, %cst_133 [1] : vector<16x32xf32> to vector<16xf32>
    %157 = vector.shape_cast %156 : vector<16xf32> to vector<16x1xf32>
    %cst_134 = arith.constant 3.200000e+01 : f32
    %158 = vector.broadcast %cst_134 : f32 to vector<16x1xf32>
    %159 = arith.divf %157, %158 : vector<16x1xf32>
    %160 = vector.broadcast %159 : vector<16x1xf32> to vector<16x32xf32>
    %161 = arith.subf %151, %160 : vector<16x32xf32>
    %162 = arith.mulf %161, %161 : vector<16x32xf32>
    %cst_135 = arith.constant dense<0.000000e+00> : vector<16xf32>
    %163 = vector.multi_reduction <add>, %162, %cst_135 [1] : vector<16x32xf32> to vector<16xf32>
    %164 = vector.shape_cast %163 : vector<16xf32> to vector<16x1xf32>
    %cst_136 = arith.constant 3.200000e+01 : f32
    %165 = vector.broadcast %cst_136 : f32 to vector<16x1xf32>
    %166 = arith.divf %164, %165 : vector<16x1xf32>
    %cst_137 = arith.constant 9.99999974E-6 : f32
    %167 = vector.broadcast %cst_137 : f32 to vector<16x1xf32>
    %168 = arith.addf %166, %167 : vector<16x1xf32>
    %169 = math.rsqrt %168 : vector<16x1xf32>
    %170 = vector.broadcast %169 : vector<16x1xf32> to vector<16x32xf32>
    %171 = arith.mulf %161, %170 : vector<16x32xf32>
    %172 = arith.mulf %171, %153 : vector<16x32xf32>
    %173 = arith.addf %172, %155 : vector<16x32xf32>
    %c1_138 = arith.constant 1 : index
    %c0_139 = arith.constant 0 : index
    %c0_140 = arith.constant 0 : index
    %174 = vector.load %arg6[%c1_138, %c0_139, %c0_140] : memref<2x32x64xf32, #tpu.memory_space<vmem>>, vector<1x32x64xf32>
    %175 = vector.shape_cast %174 : vector<1x32x64xf32> to vector<32x64xf32>
    %cst_141 = arith.constant dense<0.000000e+00> : vector<16x64xf32>
    %176 = tpu.matmul %173, %175, %cst_141 {dimension_numbers = #tpu.dot_dimension_numbers<[1], [0], [0], [1], [0, 0, 1, 1], [], []>} : vector<16x32xf32>, vector<32x64xf32>, vector<16x64xf32> -> vector<16x64xf32>
    %c11 = arith.constant 11 : index
    %c0_142 = arith.constant 0 : index
    %c0_143 = arith.constant 0 : index
    %177 = vector.load %arg8[%c11, %c0_142, %c0_143] : memref<15x16x64xf32, #tpu.memory_space<vmem>>, vector<1x16x64xf32>
    %178 = vector.shape_cast %177 : vector<1x16x64xf32> to vector<16x64xf32>
    %179 = arith.addf %176, %178 : vector<16x64xf32>
    %cst_144 = arith.constant 0.000000e+00 : f32
    %180 = vector.broadcast %cst_144 : f32 to vector<16x64xf32>
    %181 = arith.maximumf %179, %180 : vector<16x64xf32>
    %c1_145 = arith.constant 1 : index
    %c0_146 = arith.constant 0 : index
    %c0_147 = arith.constant 0 : index
    %182 = vector.load %arg7[%c1_145, %c0_146, %c0_147] : memref<2x64x32xf32, #tpu.memory_space<vmem>>, vector<1x64x32xf32>
    %183 = vector.shape_cast %182 : vector<1x64x32xf32> to vector<64x32xf32>
    %cst_148 = arith.constant dense<0.000000e+00> : vector<16x32xf32>
    %184 = tpu.matmul %181, %183, %cst_148 {dimension_numbers = #tpu.dot_dimension_numbers<[1], [0], [0], [1], [0, 0, 1, 1], [], []>} : vector<16x64xf32>, vector<64x32xf32>, vector<16x32xf32> -> vector<16x32xf32>
    %c12 = arith.constant 12 : index
    %c0_149 = arith.constant 0 : index
    %c0_150 = arith.constant 0 : index
    %185 = vector.load %arg8[%c12, %c0_149, %c0_150] : memref<15x16x64xf32, #tpu.memory_space<vmem>>, vector<1x16x32xf32>
    %186 = vector.shape_cast %185 : vector<1x16x32xf32> to vector<16x32xf32>
    %187 = arith.addf %184, %186 : vector<16x32xf32>
    %188 = arith.addf %173, %187 : vector<16x32xf32>
    %c13 = arith.constant 13 : index
    %c0_151 = arith.constant 0 : index
    %c0_152 = arith.constant 0 : index
    %189 = vector.load %arg8[%c13, %c0_151, %c0_152] : memref<15x16x64xf32, #tpu.memory_space<vmem>>, vector<1x16x32xf32>
    %190 = vector.shape_cast %189 : vector<1x16x32xf32> to vector<16x32xf32>
    %c14 = arith.constant 14 : index
    %c0_153 = arith.constant 0 : index
    %c0_154 = arith.constant 0 : index
    %191 = vector.load %arg8[%c14, %c0_153, %c0_154] : memref<15x16x64xf32, #tpu.memory_space<vmem>>, vector<1x16x32xf32>
    %192 = vector.shape_cast %191 : vector<1x16x32xf32> to vector<16x32xf32>
    %cst_155 = arith.constant dense<0.000000e+00> : vector<16xf32>
    %193 = vector.multi_reduction <add>, %188, %cst_155 [1] : vector<16x32xf32> to vector<16xf32>
    %194 = vector.shape_cast %193 : vector<16xf32> to vector<16x1xf32>
    %cst_156 = arith.constant 3.200000e+01 : f32
    %195 = vector.broadcast %cst_156 : f32 to vector<16x1xf32>
    %196 = arith.divf %194, %195 : vector<16x1xf32>
    %197 = vector.broadcast %196 : vector<16x1xf32> to vector<16x32xf32>
    %198 = arith.subf %188, %197 : vector<16x32xf32>
    %199 = arith.mulf %198, %198 : vector<16x32xf32>
    %cst_157 = arith.constant dense<0.000000e+00> : vector<16xf32>
    %200 = vector.multi_reduction <add>, %199, %cst_157 [1] : vector<16x32xf32> to vector<16xf32>
    %201 = vector.shape_cast %200 : vector<16xf32> to vector<16x1xf32>
    %cst_158 = arith.constant 3.200000e+01 : f32
    %202 = vector.broadcast %cst_158 : f32 to vector<16x1xf32>
    %203 = arith.divf %201, %202 : vector<16x1xf32>
    %cst_159 = arith.constant 9.99999974E-6 : f32
    %204 = vector.broadcast %cst_159 : f32 to vector<16x1xf32>
    %205 = arith.addf %203, %204 : vector<16x1xf32>
    %206 = math.rsqrt %205 : vector<16x1xf32>
    %207 = vector.broadcast %206 : vector<16x1xf32> to vector<16x32xf32>
    %208 = arith.mulf %198, %207 : vector<16x32xf32>
    %209 = arith.mulf %208, %190 : vector<16x32xf32>
    %210 = arith.addf %209, %192 : vector<16x32xf32>
    %c0_160 = arith.constant 0 : index
    %c0_161 = arith.constant 0 : index
    %211 = vector.load %arg9[%c0_160, %c0_161] : memref<16x32xf32, #tpu.memory_space<vmem>>, vector<16x32xf32>
    tpu.vector_store %arg9[%c0_160, %c0_161], %210 {strides = array<i32>} : memref<16x32xf32, #tpu.memory_space<vmem>>, vector<16x32xf32>,
    return
  }
}

</mosaic_0001>

<bundles_post_ra>
// kernel: encoder_forward.1
= control target key start
LH: loop header
LB: loop body
LE: loop exit
PB: predicated region body
PF: predicated region fallthrough
CT: control target
= control target key end

     0   :  { %vm45_vm0 = vcmask 1043456   ;;  %vm38_vm1 = vcmask 31744   ;;  %s7312_s0 = inlined_call_operand.vmem [shape: f32[16,4], index: 0, kind: input, shape index: {}]   ;;  %s7313_s1 = inlined_call_operand.vmem [shape: f32[16,16], index: 1, kind: input, shape index: {}]   ;;  %s7314_s2 = inlined_call_operand.vmem [shape: f32[4,32], index: 2, kind: input, shape index: {}]   ;;  %s7315_s3 = inlined_call_operand.vmem [shape: f32[2,3,4,32,8], index: 3, kind: input, shape index: {}]   ;;  %s7316_s4 = inlined_call_operand.vmem [shape: f32[2,3,4,16,8], index: 4, kind: input, shape index: {}]   ;;  %s7317_s5 = inlined_call_operand.vmem [shape: f32[2,4,8,32], index: 5, kind: input, shape index: {}]   ;;  %s7318_s6 = inlined_call_operand.vmem [shape: f32[2,32,64], index: 6, kind: input, shape index: {}]   ;;  %s7319_s7 = inlined_call_operand.vmem [shape: f32[2,64,32], index: 7, kind: input, shape index: {}]   ;;  %s7320_s8 = inlined_call_operand.vmem [shape: f32[15,16,64], index: 8, kind: input, shape index: {}]   ;;  %s7321_s9 = inlined_call_operand.hbm [shape: f32[16,32], index: 9, kind: output, shape index: {}]  }
   0x1   :  { %v35_v0 = vld [vmem:[%s7314_s2] sm:$0xf]  ;;  %v34_v2 = vld [vmem:[%s7312_s0 + $0x8] sm:$0xff] }
   0x2   :  { %v33_v1 = vld [vmem:[%s7312_s0] sm:$0xff]  ;;  %5402 = vmatprep.subr.msk.mxu0 %vm45_vm0, %v35_v0  ;;  %v127_v4 = vld [vmem:[%s7315_s3 + $0x8] sm:$0xff] }
   0x3   :  { %5404 = vmatprep.mubr.msk.f32.mxu0 %vm38_vm1, %v33_v1  ;;  %v126_v3 = vld [vmem:[%s7315_s3] sm:$0xff]  ;;  %5403 = vmatpush3.msk.msra.mxu0 %vm45_vm0, %v35_v0  ;;  %v131_v7 = vld [vmem:[%s7315_s3 + $0x28] sm:$0xff] }
   0x4   :  { %v130_v5 = vld [vmem:[%s7315_s3 + $0x20] sm:$0xff]  ;;  %v5883_v6 = vpack.c.bf16 %v127_v4, %v126_v3 }
   0x5   :  { %14 = vsyncpa [#allocation3], 0  ;;  %5405 = vmatmul.mubr.msk.f32.vlgmr.msra.gmra.mrb[0].mxu0 %vm38_vm1, %v34_v2  ;;  %v5891_v8 = vpack.c.bf16 %v131_v7, %v130_v5  ;;  %v128_v9 = vld [vmem:[%s7315_s3 + $0x10] sm:$0xff]  ;;  %v129_v10 = vld [vmem:[%s7315_s3 + $0x18] sm:$0xff]  ;;  %vm150_vm2 = vcmask 261120   ;;  %vm1109_vm3 = vcmask 64512  }
   0x6   :  { %5884 = vmatprep.subr.bf16.mxu1 %v5883_v6  ;;  %v132_v11 = vld [vmem:[%s7315_s3 + $0x30] sm:$0xff]  ;;  %v5887_v12 = vpack.c.bf16 %v129_v10, %v128_v9  ;;  %v133_v13 = vld [vmem:[%s7315_s3 + $0x38] sm:$0xff]  ;;  %v134_v15 = vld [vmem:[%s7315_s3 + $0x40] sm:$0xff]  ;;  %vm1458_vm5 = vcmask 130048   ;;  %vm2358_vm6 = vcmask 523264   ;;  %s6312_s26 = smov [#allocation2]  }
   0x7   :  { %5892 = vmatprep.subr.bf16.mxu0 %v5891_v8  ;;  %5886 = vmatpush3.bf16.msra.mxu1 %v5883_v6  ;;  %v5895_v14 = vpack.c.bf16 %v133_v13, %v132_v11  ;;  %v135_v16 = vld [vmem:[%s7315_s3 + $0x48] sm:$0xff]  ;;  %v138_v18 = vld [vmem:[%s7315_s3 + $0x60] sm:$0xff]  ;;  %v136_v24 = vld [vmem:[%s7315_s3 + $0x50] sm:$0xff]  ;;  %s4837_s27 = sshll.u32 %s6312_s26, 4  ;;  %s4838_s27 = int_to_ptr.vmem [resolvable:$true] %s4837_s27 }
   0x8   :  { %5894 = vmatpush3.bf16.msra.mxu0 %v5891_v8  ;;  %5888 = vmatprep.subr.bf16.mxu1 %v5887_v12  ;;  %v5899_v17 = vpack.c.bf16 %v135_v16, %v134_v15  ;;  %v139_v19 = vld [vmem:[%s7315_s3 + $0x68] sm:$0xff]  ;;  %v36_v21 = vld [vmem:[%s7320_s8] sm:$0xff]  ;;  %v137_v26 = vld [vmem:[%s7315_s3 + $0x58] sm:$0xff]  ;;  %s6288_s28 = scalar_lea.vmem %s4838_s27, 256  ;;  %p6293_p1 = scmp.lt.s32.totalorder %s4838_s27, %s4838_s27 }
   0x9   :  { %5896 = vmatprep.subr.bf16.mxu0 %v5895_v14  ;;  %v5907_v20 = vpack.c.bf16 %v139_v19, %v138_v18  ;;  %v37_v22 = vld [vmem:[%s7320_s8 + $0x8] sm:$0xff]  ;;  %v140_v27 = vld [vmem:[%s7315_s3 + $0x70] sm:$0xff]  ;;  %v141_v28 = vld [vmem:[%s7315_s3 + $0x78] sm:$0xff]  ;;  %v5903_v32 = vpack.c.bf16 %v137_v26, %v136_v24  ;;  %p6289_p0 = scmp.ne.s32.totalorder %s4838_s27, %s6288_s28  ;;  %p6294_p2 = scmp.lt.s32.totalorder %s6288_s28, %s6288_s28 }
   0xa   :  { %v4859_v31 = vld [vmem:[%s7315_s3 + $0x80] sm:$0xff]  ;;  %v5911_v33 = vpack.c.bf16 %v141_v28, %v140_v27  ;;  %v4860_v34 = vld [vmem:[%s7315_s3 + $0x88] sm:$0xff]  ;;  %v4861_v39 = vld [vmem:[%s7315_s3 + $0x90] sm:$0xff] }
   0xb   :  { %5890 = vmatpush3.bf16.msra.mxu1 %v5887_v12  ;;  %v4863_v35 = vld [vmem:[%s7315_s3 + $0xa0] sm:$0xff]  ;;  %v4864_v36 = vld [vmem:[%s7315_s3 + $0xa8] sm:$0xff]  ;;  %v5915_v37 = vpack.c.bf16 %v4860_v34, %v4859_v31  ;;  %v4862_v40 = vld [vmem:[%s7315_s3 + $0x98] sm:$0xff]  ;;  %p6295_p3 = por %p6294_p2, %p6293_p1 }
   0xc   :  { %5898 = vmatpush3.bf16.msra.mxu0 %v5895_v14  ;;  %5900 = vmatprep.subr.bf16.mxu1 %v5899_v17  ;;  %v5923_v38 = vpack.c.bf16 %v4864_v36, %v4863_v35  ;;  %v4865_v41 = vld [vmem:[%s7315_s3 + $0xb0] sm:$0xff]  ;;  %v4866_v42 = vld [vmem:[%s7315_s3 + $0xb8] sm:$0xff]  ;;  %v5919_v43 = vpack.c.bf16 %v4862_v40, %v4861_v39  ;;  %v4867_v45 = vld [vmem:[%s7315_s3 + $0xc0] sm:$0xff] }
   0xd   :  { %5908 = vmatprep.subr.bf16.mxu0 %v5907_v20  ;;  %v5927_v44 = vpack.c.bf16 %v4866_v42, %v4865_v41  ;;  %v4868_v46 = vld [vmem:[%s7315_s3 + $0xc8] sm:$0xff]  ;;  %v4871_v47 = vld [vmem:[%s7315_s3 + $0xe0] sm:$0xff]  ;;  %v4869_v51 = vld [vmem:[%s7315_s3 + $0xd0] sm:$0xff]  ;;  %p6296_p4 = pnand %p6295_p3, %p6289_p0 }
   0xe   :  { %v4872_v48 = vld [vmem:[%s7315_s3 + $0xe8] sm:$0xff]  ;;  %v5931_v49 = vpack.c.bf16 %v4868_v46, %v4867_v45  ;;  %v4870_v52 = vld [vmem:[%s7315_s3 + $0xd8] sm:$0xff]  ;;  %v4873_v53 = vld [vmem:[%s7315_s3 + $0xf0] sm:$0xff] }
   0xf   :  { %v5939_v50 = vpack.c.bf16 %v4872_v48, %v4871_v47  ;;  %v4874_v54 = vld [vmem:[%s7315_s3 + $0xf8] sm:$0xff]  ;;  %v5935_v55 = vpack.c.bf16 %v4870_v52, %v4869_v51  ;;  %v4891_v56 = vld [vmem:[%s7315_s3 + $0x100] sm:$0xff]  ;;  %v4892_v57 = vld [vmem:[%s7315_s3 + $0x108] sm:$0xff] }
  0x10   :  { %v5943_v58 = vpack.c.bf16 %v4874_v54, %v4873_v53  ;;  %v4895_v59 = vld [vmem:[%s7315_s3 + $0x120] sm:$0xff]  ;;  %v4896_v60 = vld [vmem:[%s7315_s3 + $0x128] sm:$0xff]  ;;  %v5947_v61 = vpack.c.bf16 %v4892_v57, %v4891_v56  ;;  %v4893_v63 = vld [vmem:[%s7315_s3 + $0x110] sm:$0xff] }
  0x11   :  { %v5955_v62 = vpack.c.bf16 %v4896_v60, %v4895_v59  ;;  %v4894_v0 = vld [vmem:[%s7315_s3 + $0x118] sm:$0xff]  ;;  %v4897_v1 = vld [vmem:[%s7315_s3 + $0x130] sm:$0xff]  ;;  %v4899_v4 = vld [vmem:[%s7315_s3 + $0x140] sm:$0xff] }
  0x12   :  { %v4898_v2 = vld [vmem:[%s7315_s3 + $0x138] sm:$0xff]  ;;  %v5951_v3 = vpack.c.bf16 %v4894_v0, %v4893_v63  ;;  %v4900_v5 = vld [vmem:[%s7315_s3 + $0x148] sm:$0xff]  ;;  %v4903_v7 = vld [vmem:[%s7315_s3 + $0x160] sm:$0xff] }
  0x13   :  { %v5959_v6 = vpack.c.bf16 %v4898_v2, %v4897_v1  ;;  %v4904_v8 = vld [vmem:[%s7315_s3 + $0x168] sm:$0xff]  ;;  %v5963_v9 = vpack.c.bf16 %v4900_v5, %v4899_v4  ;;  %v4901_v11 = vld [vmem:[%s7315_s3 + $0x150] sm:$0xff]  ;;  %v4902_v12 = vld [vmem:[%s7315_s3 + $0x158] sm:$0xff] }
  0x14   :  { %v5971_v10 = vpack.c.bf16 %v4904_v8, %v4903_v7  ;;  %v4905_v13 = vld [vmem:[%s7315_s3 + $0x170] sm:$0xff]  ;;  %v4906_v14 = vld [vmem:[%s7315_s3 + $0x178] sm:$0xff]  ;;  %v5967_v15 = vpack.c.bf16 %v4902_v12, %v4901_v11  ;;  %v4876_v31 = vld [vmem:[%s7316_s4 + $0x48] sm:$0xff] }
  0x15   :  { %v5975_v16 = vpack.c.bf16 %v4906_v14, %v4905_v13  ;;  %v144_v18 = vld [vmem:[%s7316_s4 + $0x10] sm:$0xff]  ;;  %vm6602_vm4 = vmpackc.low %vm1109_vm3, %vm1109_vm3  ;;  %v4880_v46 = vld [vmem:[%s7316_s4 + $0x68] sm:$0xff] }
  0x16   :  { %v4877_v35 = vld [vmem:[%s7316_s4 + $0x50] sm:$0xff]  ;;  %v4882_v47 = vld [vmem:[%s7316_s4 + $0x78] sm:$0xff]  ;;  %v4879_v48 = vld [vmem:[%s7316_s4 + $0x60] sm:$0xff] }
  0x17   :  { %v143_v51 = vld [vmem:[%s7316_s4 + $0x8] sm:$0xff]  ;;  %v146_v59 = vld [vmem:[%s7316_s4 + $0x20] sm:$0xff]  ;;  %v4910_v5 = vld [vmem:[%s7316_s4 + $0x98] sm:$0xff] }
  0x18   :  { %v4909_v8 = vld [vmem:[%s7316_s4 + $0x90] sm:$0xff]  ;;  %v147_v12 = vld [vmem:[%s7316_s4 + $0x28] sm:$0xff] }
  0xd8   :  { %v5406_v23 = vpop.f32.mrb[0].mxu0 }
  0xd9   :  { %v115_v25 = vpop.f32.mrb[1].mxu0  ;;  %v6430_v30 = vadd.f32 %v5406_v23, %v37_v22 }
  0xda   :  { %v6428_v29 = vadd.f32 %v115_v25, %v36_v21 }
  0xdc   :  { %5415 = vmatprep.mubr.msk.f32.mxu1 %vm150_vm2, %v6428_v29  ;;  %5426 = vmatprep.mubr.msk.f32.mxu0 %vm150_vm2, %v6428_v29 }
  0xdd   :  { %5416 = vmatmul.mubr.msk.f32.vlgmr.msra.gmra.mrb[0].mxu1 %vm150_vm2, %v6430_v30  ;;  %5427 = vmatmul.mubr.msk.f32.vlgmr.msra.gmra.mrb[2].mxu0 %vm150_vm2, %v6430_v30 }
  0xde   :  { %5902 = vmatpush3.bf16.msra.mxu1 %v5899_v17  ;;  %5910 = vmatpush3.bf16.msra.mxu0 %v5907_v20  ;;  %v142_v17 = vld [vmem:[%s7316_s4] sm:$0xff] }
  0xdf   :  { %5437 = vmatprep.mubr.msk.f32.mxu1 %vm150_vm2, %v6428_v29  ;;  %5448 = vmatprep.mubr.msk.f32.mxu0 %vm150_vm2, %v6428_v29 }
  0xe0   :  { %5904 = vmatprep.subr.bf16.mxu1 %v5903_v32  ;;  %5912 = vmatprep.subr.bf16.mxu0 %v5911_v33 }
  0xe2   :  { %5906 = vmatpush3.bf16.msra.mxu1 %v5903_v32  ;;  %5914 = vmatpush3.bf16.msra.mxu0 %v5911_v33  ;;  %v4878_v32 = vld [vmem:[%s7316_s4 + $0x58] sm:$0xff]  ;;  %v4875_v33 = vld [vmem:[%s7316_s4 + $0x40] sm:$0xff] }
  0xe3   :  { %5916 = vmatprep.subr.bf16.mxu1 %v5915_v37  ;;  %5924 = vmatprep.subr.bf16.mxu0 %v5923_v38 }
  0xe5   :  { %5438 = vmatmul.mubr.msk.f32.vlgmr.msra.gmra.mrb[2].mxu1 %vm150_vm2, %v6430_v30  ;;  %5449 = vmatmul.mubr.msk.f32.vlgmr.msra.gmra.mrb[4].mxu0 %vm150_vm2, %v6430_v30 }
  0xe6   :  { %5918 = vmatpush3.bf16.msra.mxu1 %v5915_v37  ;;  %5459 = vmatprep.mubr.msk.f32.mxu1 %vm150_vm2, %v6428_v29 }
  0xe7   :  { %5926 = vmatpush3.bf16.msra.mxu0 %v5923_v38  ;;  %5470 = vmatprep.mubr.msk.f32.mxu0 %vm150_vm2, %v6428_v29 }
  0xe8   :  { %5920 = vmatprep.subr.bf16.mxu1 %v5919_v43  ;;  %5928 = vmatprep.subr.bf16.mxu0 %v5927_v44 }
  0xea   :  { %5922 = vmatpush3.bf16.msra.mxu1 %v5919_v43  ;;  %v5060_v43 = vld [vmem:[%s7316_s4 + $0x178] sm:$0xff] }
  0xeb   :  { %5930 = vmatpush3.bf16.msra.mxu0 %v5927_v44  ;;  %5932 = vmatprep.subr.bf16.mxu1 %v5931_v49 }
  0xec   :  { %5940 = vmatprep.subr.bf16.mxu0 %v5939_v50 }
  0xed   :  { %5460 = vmatmul.mubr.msk.f32.vlgmr.msra.gmra.mrb[4].mxu1 %vm150_vm2, %v6430_v30 }
  0xee   :  { %5471 = vmatmul.mubr.msk.f32.vlgmr.msra.gmra.mrb[6].mxu0 %vm150_vm2, %v6430_v30  ;;  %5934 = vmatpush3.bf16.msra.mxu1 %v5931_v49 }
  0xef   :  { %5481 = vmatprep.mubr.msk.f32.mxu1 %vm150_vm2, %v6428_v29  ;;  %5942 = vmatpush3.bf16.msra.mxu0 %v5939_v50  ;;  %v4881_v50 = vld [vmem:[%s7316_s4 + $0x70] sm:$0xff] }
  0xf0   :  { %5492 = vmatprep.mubr.msk.f32.mxu0 %vm150_vm2, %v6428_v29  ;;  %5936 = vmatprep.subr.bf16.mxu1 %v5935_v55 }
  0xf1   :  { %5944 = vmatprep.subr.bf16.mxu0 %v5943_v58 }
  0xf2   :  { %5938 = vmatpush3.bf16.msra.mxu1 %v5935_v55  ;;  %v145_v55 = vld [vmem:[%s7316_s4 + $0x18] sm:$0xff] }
  0xf3   :  { %5946 = vmatpush3.bf16.msra.mxu0 %v5943_v58  ;;  %5948 = vmatprep.subr.bf16.mxu1 %v5947_v61 }
  0xf4   :  { %5956 = vmatprep.subr.bf16.mxu0 %v5955_v62 }
  0xf5   :  { %5482 = vmatmul.mubr.msk.f32.vlgmr.msra.gmra.mrb[6].mxu1 %vm150_vm2, %v6430_v30 }
  0xf6   :  { %5493 = vmatmul.mubr.msk.f32.vlgmr.msra.gmra.mrb[8].mxu0 %vm150_vm2, %v6430_v30  ;;  %5950 = vmatpush3.bf16.msra.mxu1 %v5947_v61 }
  0xf7   :  { %5503 = vmatprep.mubr.msk.f32.mxu1 %vm150_vm2, %v6428_v29  ;;  %5958 = vmatpush3.bf16.msra.mxu0 %v5955_v62  ;;  %v148_v62 = vld [vmem:[%s7316_s4 + $0x30] sm:$0xff] }
  0xf8   :  { %5514 = vmatprep.mubr.msk.f32.mxu0 %vm150_vm2, %v6428_v29  ;;  %5952 = vmatprep.subr.bf16.mxu1 %v5951_v3 }
  0xf9   :  { %5960 = vmatprep.subr.bf16.mxu0 %v5959_v6 }
  0xfa   :  { %5954 = vmatpush3.bf16.msra.mxu1 %v5951_v3  ;;  %v4908_v3 = vld [vmem:[%s7316_s4 + $0x88] sm:$0xff] }
  0xfb   :  { %5962 = vmatpush3.bf16.msra.mxu0 %v5959_v6  ;;  %5964 = vmatprep.subr.bf16.mxu1 %v5963_v9  ;;  %v4907_v6 = vld [vmem:[%s7316_s4 + $0x80] sm:$0xff] }
  0xfc   :  { %5972 = vmatprep.subr.bf16.mxu0 %v5971_v10 }
  0xfd   :  { %5504 = vmatmul.mubr.msk.f32.vlgmr.msra.gmra.mrb[8].mxu1 %vm150_vm2, %v6430_v30 }
  0xfe   :  { %5515 = vmatmul.mubr.msk.f32.vlgmr.msra.gmra.mrb[10].mxu0 %vm150_vm2, %v6430_v30  ;;  %5966 = vmatpush3.bf16.msra.mxu1 %v5963_v9 }
  0xff   :  { %5525 = vmatprep.mubr.msk.f32.mxu1 %vm150_vm2, %v6428_v29  ;;  %5974 = vmatpush3.bf16.msra.mxu0 %v5971_v10 }
 0x100   :  { %5536 = vmatprep.mubr.msk.f32.mxu0 %vm150_vm2, %v6428_v29  ;;  %5968 = vmatprep.subr.bf16.mxu1 %v5967_v15 }
 0x101   :  { %5976 = vmatprep.subr.bf16.mxu0 %v5975_v16 }
 0x102   :  { %5970 = vmatpush3.bf16.msra.mxu1 %v5967_v15 }
 0x103   :  { %5978 = vmatpush3.bf16.msra.mxu0 %v5975_v16  ;;  %v149_v16 = vld [vmem:[%s7316_s4 + $0x38] sm:$0xff] }
 0x105   :  { %5526 = vmatmul.mubr.msk.f32.vlgmr.msra.gmra.mrb[10].mxu1 %vm150_vm2, %v6430_v30 }
 0x106   :  { %5537 = vmatmul.mubr.msk.f32.vlgmr.msra.gmra.mrb[12].mxu0 %vm150_vm2, %v6430_v30 }
 0x1b0   :  { %v5417_v19 = vpop.f32.mrb[0].mxu1  ;;  %v5428_v20 = vpop.f32.mrb[2].mxu0 }
 0x1b1   :  { %v223_v21 = vpop.f32.mrb[1].mxu1  ;;  %v298_v22 = vpop.f32.mrb[3].mxu0  ;;  %v229_v61 = vadd.f32 %v5417_v19, %v143_v51  ;;  %v304_v0 = vadd.f32 %v5428_v20, %v145_v55 }
 0x1b2   :  { %v224_v23 = vadd.f32 %v223_v21, %v142_v17  ;;  %v299_v24 = vadd.f32 %v298_v22, %v144_v18  ;;  %v4912_v22 = vld [vmem:[%s7316_s4 + $0xa8] sm:$0xff] }
 0x1b4   :  { %5543 = vmatprep.mubr.msk.f32.mxu1 %vm1109_vm3, %v224_v23  ;;  %5550 = vmatprep.mubr.msk.f32.mxu0 %vm1109_vm3, %v299_v24  ;;  %v4914_v23 = vld [vmem:[%s7316_s4 + $0xb8] sm:$0xff]  ;;  %v4911_v24 = vld [vmem:[%s7316_s4 + $0xa0] sm:$0xff] }
 0x1b8   :  { %v6584_v25 = vpop.f32.mrb[2].mxu1  ;;  %v6586_v26 = vpop.f32.mrb[4].mxu0 }
 0x1b9   :  { %v373_v27 = vpop.f32.mrb[3].mxu1  ;;  %v448_v28 = vpop.f32.mrb[5].mxu0  ;;  %v379_v19 = vadd.f32 %v6584_v25, %v147_v12  ;;  %v454_v21 = vadd.f32 %v6586_v26, %v149_v16  ;;  %v4913_v26 = vld [vmem:[%s7316_s4 + $0xb0] sm:$0xff] }
 0x1ba   :  { %v374_v2 = vadd.f32 %v373_v27, %v146_v59  ;;  %v449_v4 = vadd.f32 %v448_v28, %v148_v62 }
 0x1c0   :  { %v5461_v34 = vpop.f32.mrb[4].mxu1 }
 0x1c1   :  { %v555_v36 = vadd.f32 %v5461_v34, %v4876_v31  ;;  %v5472_v37 = vpop.f32.mrb[6].mxu0  ;;  %v549_v38 = vpop.f32.mrb[5].mxu1 }
 0x1c2   :  { %v630_v39 = vadd.f32 %v5472_v37, %v4878_v32  ;;  %v550_v40 = vadd.f32 %v4875_v33, %v549_v38  ;;  %v624_v41 = vpop.f32.mrb[7].mxu0  ;;  %v125_v38 = vld [vmem:[%s7313_s1 + $0x8] sm:$0xff] }
 0x1c3   :  { %v625_v42 = vadd.f32 %v4877_v35, %v624_v41 }
 0x1c4   :  { %v5979_v44 = vpack.c.bf16 %v555_v36, %v550_v40 }
 0x1c5   :  { %v5985_v45 = vpack.c.bf16 %v630_v39, %v625_v42  ;;  %v124_v39 = vld [vmem:[%s7313_s1] sm:$0xff] }
 0x1c6   :  { %5981 = vmatprep.subr.msk.bf16.mxu1 %vm6602_vm4, %v5979_v44 }
 0x1c7   :  { %5987 = vmatprep.subr.msk.bf16.mxu0 %vm6602_vm4, %v5985_v45  ;;  %5984 = vmatpush3.bf16.xpose.msk.msra.mxu1 %vm6602_vm4, %v5979_v44 }
 0x1c8   :  { %5990 = vmatpush3.bf16.xpose.msk.msra.mxu0 %vm6602_vm4, %v5985_v45  ;;  %v5483_v49 = vpop.f32.mrb[6].mxu1 }
 0x1c9   :  { %v705_v52 = vadd.f32 %v5483_v49, %v4880_v46  ;;  %v5494_v53 = vpop.f32.mrb[8].mxu0  ;;  %v699_v54 = vpop.f32.mrb[7].mxu1 }
 0x1ca   :  { %v780_v56 = vadd.f32 %v5494_v53, %v4882_v47  ;;  %v700_v57 = vadd.f32 %v4879_v48, %v699_v54  ;;  %v774_v58 = vpop.f32.mrb[9].mxu0 }
 0x1cb   :  { %v775_v60 = vadd.f32 %v4881_v50, %v774_v58 }
 0x1cc   :  { %v5991_v63 = vpack.c.bf16 %v705_v52, %v700_v57 }
 0x1cd   :  { %v5997_v1 = vpack.c.bf16 %v780_v56, %v775_v60 }
 0x1ce   :  { %5544 = vmatmul.mubr.msk.f32.vlgmr.msra.gmra.mrb[12].mxu1 %vm1109_vm3, %v229_v61  ;;  %5993 = vmatprep.subr.msk.bf16.mxu1 %vm6602_vm4, %v5991_v63 }
 0x1cf   :  { %5551 = vmatmul.mubr.msk.f32.vlgmr.msra.gmra.mrb[14].mxu0 %vm1109_vm3, %v304_v0  ;;  %5999 = vmatprep.subr.msk.bf16.mxu0 %vm6602_vm4, %v5997_v1 }
 0x1d0   :  { %5996 = vmatpush3.bf16.xpose.msk.msra.mxu1 %vm6602_vm4, %v5991_v63  ;;  %5557 = vmatprep.mubr.msk.f32.mxu1 %vm1109_vm3, %v374_v2  ;;  %v5505_v7 = vpop.f32.mrb[8].mxu1 }
 0x1d1   :  { %6002 = vmatpush3.bf16.xpose.msk.msra.mxu0 %vm6602_vm4, %v5997_v1  ;;  %5564 = vmatprep.mubr.msk.f32.mxu0 %vm1109_vm3, %v449_v4  ;;  %v881_v9 = vadd.f32 %v5505_v7, %v4908_v3  ;;  %v5516_v10 = vpop.f32.mrb[10].mxu0  ;;  %v875_v11 = vpop.f32.mrb[9].mxu1 }
 0x1d2   :  { %v956_v13 = vadd.f32 %v5516_v10, %v4910_v5  ;;  %v876_v14 = vadd.f32 %v4907_v6, %v875_v11  ;;  %v950_v15 = vpop.f32.mrb[11].mxu0 }
 0x1d3   :  { %v951_v17 = vadd.f32 %v4909_v8, %v950_v15 }
 0x1d4   :  { %v6003_v18 = vpack.c.bf16 %v881_v9, %v876_v14 }
 0x1d5   :  { %v6669_v20 = vpack.c.bf16 %v956_v13, %v951_v17 }
 0x1d6   :  { %6004 = vmatprep.subr.bf16.mxu1 %v6003_v18 }
 0x1d7   :  { %5558 = vmatmul.mubr.msk.f32.vlgmr.msra.gmra.mrb[14].mxu1 %vm1109_vm3, %v379_v19 }
 0x1d8   :  { %5565 = vmatmul.mubr.msk.f32.vlgmr.msra.gmra.mrb[16].mxu0 %vm1109_vm3, %v454_v21  ;;  %6006 = vmatpush3.bf16.msra.mxu1 %v6003_v18  ;;  %v5527_v25 = vpop.f32.mrb[10].mxu1 }
 0x1d9   :  { %v1031_v27 = vadd.f32 %v5527_v25, %v4912_v22  ;;  %v5538_v28 = vpop.f32.mrb[12].mxu0  ;;  %6008 = vmatprep.subr.bf16.mxu1 %v6669_v20  ;;  %v1025_v31 = vpop.f32.mrb[11].mxu1 }
 0x1da   :  { %v1106_v32 = vadd.f32 %v5538_v28, %v4914_v23  ;;  %v1026_v33 = vadd.f32 %v4911_v24, %v1025_v31  ;;  %v1100_v34 = vpop.f32.mrb[13].mxu0 }
 0x1db   :  { %v1101_v35 = vadd.f32 %v4913_v26, %v1100_v34 }
 0x1dc   :  { %v6687_v36 = vpack.c.bf16 %v1031_v27, %v1026_v33 }
 0x1dd   :  { %v6015_v37 = vpack.c.bf16 %v1106_v32, %v1101_v35 }
 0x1df   :  { %6016 = vmatprep.subr.bf16.mxu0 %v6015_v37 }
 0x1e0   :  { %6018 = vmatpush3.bf16.msra.mxu0 %v6015_v37 }
 0x2a1   :  { %v5545_v40 = vpop.f32.mrb[12].mxu1 }
 0x2a2   :  { %v5552_v41 = vpop.f32.mrb[14].mxu0  ;;  %v1188_v42 = vpop.f32.mrb[13].mxu1  ;;  %v1194_v47 = vadd.f32 %v5545_v40, %v125_v38 }
 0x2a3   :  { %v1281_v44 = vadd.f32 %v5552_v41, %v125_v38  ;;  %v1189_v45 = vadd.f32 %v1188_v42, %v124_v39  ;;  %v1275_v46 = vpop.f32.mrb[15].mxu0 }
 0x2a4   :  { %v1276_v48 = vadd.f32 %v1275_v46, %v124_v39  ;;  %v1462_v52 = vsel %vm1458_vm5, %v1194_v47, -inf }
 0x2a5   :  { %v1468_v49 = vsel %vm1458_vm5, %v1281_v44, -inf  ;;  %v1459_v50 = vsel %vm1458_vm5, %v1189_v45, -inf }
 0x2a6   :  { %1469 = vmax.xlane.f32.xlu1 %v1468_v49  ;;  %1460 = vmax.xlane.f32.xlu0 %v1459_v50  ;;  %v1465_v51 = vsel %vm1458_vm5, %v1276_v48, -inf }
 0x2aa   :  { %1466 = vmax.xlane.f32.xlu1 %v1465_v51  ;;  %v5559_v53 = vpop.f32.mrb[14].mxu1  ;;  %1463 = vmax.xlane.f32.xlu0 %v1462_v52 }
 0x2ab   :  { %v5566_v54 = vpop.f32.mrb[16].mxu0  ;;  %v1368_v55 = vadd.f32 %v5559_v53, %v125_v38  ;;  %v1362_v56 = vpop.f32.mrb[15].mxu1 }
 0x2ac   :  { %v1363_v57 = vadd.f32 %v1362_v56, %v124_v39  ;;  %v1449_v58 = vpop.f32.mrb[17].mxu0  ;;  %v1455_v59 = vadd.f32 %v5566_v54, %v125_v38 }
 0x2ad   :  { %v1474_v60 = vsel %vm1458_vm5, %v1368_v55, -inf  ;;  %v1450_v61 = vadd.f32 %v1449_v58, %v124_v39 }
 0x2ae   :  { %1475 = vmax.xlane.f32.xlu1 %v1474_v60  ;;  %v1471_v62 = vsel %vm1458_vm5, %v1363_v57, -inf  ;;  %v1480_v63 = vsel %vm1458_vm5, %v1455_v59, -inf }
 0x2af   :  { %1472 = vmax.xlane.f32.xlu0 %v1471_v62  ;;  %v1477_v0 = vsel %vm1458_vm5, %v1450_v61, -inf }
 0x2b2   :  { %1481 = vmax.xlane.f32.xlu1 %v1480_v63 }
 0x2b3   :  { %1478 = vmax.xlane.f32.xlu0 %v1477_v0 }
 0x333   :  { %v1470_v1 = vpop.xlane.xlu1 %1469  ;;  %v1461_v2 = vpop.xlane.xlu0 %1460 }
 0x334   :  { %v1483_v3 = vsub.f32 %v1189_v45, %v1461_v2  ;;  %v1486_v5 = vsub.f32 %v1281_v44, %v1470_v1 }
 0x336   :  { %v1491_v4 = vmul.f32 1.442695, %v1483_v3  ;;  %v1497_v12 = vmul.f32 1.442695, %v1486_v5  ;;  %v1871_v5 = vld [vmem:[%s7317_s5] sm:$0xff] }
 0x337   :  { %v1467_v6 = vpop.xlane.xlu1 %1466  ;;  %v1464_v7 = vpop.xlane.xlu0 %1463 }
 0x338   :  { %v1485_v8 = vsub.f32 %v1276_v48, %v1467_v6  ;;  %v1484_v9 = vsub.f32 %v1194_v47, %v1464_v7  ;;  %6206 = vpow2.f32 %v1491_v4  ;;  %v1873_v6 = vld [vmem:[%s7317_s5 + $0x10] sm:$0xff]  ;;  %v1874_v7 = vld [vmem:[%s7317_s5 + $0x18] sm:$0xff] }
 0x33a   :  { %v1495_v10 = vmul.f32 1.442695, %v1485_v8  ;;  %v1493_v11 = vmul.f32 1.442695, %v1484_v9 }
 0x33b   :  { %v1476_v13 = vpop.xlane.xlu1 %1475 }
 0x33c   :  { %6208 = vpow2.f32 %v1495_v10  ;;  %v1488_v14 = vsub.f32 %v1368_v55, %v1476_v13  ;;  %v1473_v15 = vpop.xlane.xlu0 %1472 }
 0x33d   :  { %6210 = vpow2.f32 %v1493_v11  ;;  %v1487_v16 = vsub.f32 %v1363_v57, %v1473_v15 }
 0x33e   :  { %6212 = vpow2.f32 %v1497_v12  ;;  %v1501_v17 = vmul.f32 1.442695, %v1488_v14 }
 0x33f   :  { %v1499_v18 = vmul.f32 1.442695, %v1487_v16  ;;  %v1482_v19 = vpop.xlane.xlu1 %1481 }
 0x340   :  { %v1490_v21 = vsub.f32 %v1455_v59, %v1482_v19  ;;  %v1479_v22 = vpop.xlane.xlu0 %1478 }
 0x341   :  { %6214 = vpow2.f32 %v1499_v18  ;;  %v1489_v23 = vsub.f32 %v1450_v61, %v1479_v22 }
 0x342   :  { %v6207_v24 = vpop.eup %6206  ;;  %6216 = vpow2.f32 %v1501_v17  ;;  %v1505_v25 = vmul.f32 1.442695, %v1490_v21 }
 0x343   :  { %v1503_v26 = vmul.f32 1.442695, %v1489_v23  ;;  %v1507_v27 = vsel %vm1458_vm5, %v6207_v24, 0.0 }
 0x344   :  { %1508 = vadd.xlane.f32.xlu0 %v1507_v27 }
 0x345   :  { %6218 = vpow2.f32 %v1503_v26 }
 0x346   :  { %v6209_v28 = vpop.eup %6208  ;;  %6220 = vpow2.f32 %v1505_v25 }
 0x347   :  { %v6211_v31 = vpop.eup %6210  ;;  %v1513_v32 = vsel %vm1458_vm5, %v6209_v28, 0.0 }
 0x348   :  { %v1510_v33 = vsel %vm1458_vm5, %v6211_v31, 0.0  ;;  %v6213_v34 = vpop.eup %6212  ;;  %1514 = vadd.xlane.f32.xlu0 %v1513_v32 }
 0x349   :  { %1511 = vadd.xlane.f32.xlu1 %v1510_v33  ;;  %v1516_v37 = vsel %vm1458_vm5, %v6213_v34, 0.0 }
 0x34b   :  { %v6215_v35 = vpop.eup %6214 }
 0x34c   :  { %v1519_v38 = vsel %vm1458_vm5, %v6215_v35, 0.0  ;;  %v6217_v39 = vpop.eup %6216 }
 0x34d   :  { %1517 = vadd.xlane.f32.xlu1 %v1516_v37  ;;  %1520 = vadd.xlane.f32.xlu0 %v1519_v38  ;;  %v1522_v41 = vsel %vm1458_vm5, %v6217_v39, 0.0  ;;  %v4956_v38 = vld [vmem:[%s7320_s8 + $0x18] sm:$0xff] }
 0x34f   :  { %v6219_v40 = vpop.eup %6218 }
 0x350   :  { %v1525_v42 = vsel %vm1458_vm5, %v6219_v40, 0.0  ;;  %v6221_v44 = vpop.eup %6220 }
 0x351   :  { %1523 = vadd.xlane.f32.xlu1 %v1522_v41  ;;  %1526 = vadd.xlane.f32.xlu0 %v1525_v42  ;;  %v1528_v45 = vsel %vm1458_vm5, %v6221_v44, 0.0  ;;  %v4955_v42 = vld [vmem:[%s7320_s8 + $0x10] sm:$0xff] }
 0x355   :  { %1529 = vadd.xlane.f32.xlu1 %v1528_v45 }
 0x3d1   :  { %v1509_v46 = vpop.xlane.xlu0 %1508 }
 0x3d2   :  { %6222 = vrcp.f32 %v1509_v46 }
 0x3d5   :  { %v1515_v48 = vpop.xlane.xlu0 %1514 }
 0x3d6   :  { %v1512_v47 = vpop.xlane.xlu1 %1511 }
 0x3d7   :  { %6224 = vrcp.f32 %v1512_v47 }
 0x3d8   :  { %6226 = vrcp.f32 %v1515_v48 }
 0x3da   :  { %v1518_v49 = vpop.xlane.xlu1 %1517  ;;  %v1521_v50 = vpop.xlane.xlu0 %1520 }
 0x3db   :  { %6228 = vrcp.f32 %v1518_v49 }
 0x3dc   :  { %6230 = vrcp.f32 %v1521_v50  ;;  %v6223_v51 = vpop.eup %6222 }
 0x3dd   :  { %v1539_v54 = vmul.f32 %v6223_v51, %v6207_v24 }
 0x3de   :  { %v1524_v52 = vpop.xlane.xlu1 %1523  ;;  %v1527_v53 = vpop.xlane.xlu0 %1526 }
 0x3df   :  { %6232 = vrcp.f32 %v1524_v52  ;;  %5571 = vmatprep.mubr.msk.f32.mxu1 %vm1458_vm5, %v1539_v54 }
 0x3e0   :  { %6234 = vrcp.f32 %v1527_v53 }
 0x3e1   :  { %v6225_v55 = vpop.eup %6224 }
 0x3e2   :  { %v6227_v56 = vpop.eup %6226  ;;  %v1540_v57 = vmul.f32 %v6225_v55, %v6211_v31  ;;  %v1530_v58 = vpop.xlane.xlu1 %1529 }
 0x3e3   :  { %6236 = vrcp.f32 %v1530_v58  ;;  %v1541_v59 = vmul.f32 %v6227_v56, %v6209_v28 }
 0x3e4   :  { %5572 = vmatmul.mubr.msk.f32.vlgmr.msra.gmra.mrb[16].mxu1 %vm1458_vm5, %v1540_v57 }
 0x3e5   :  { %v6229_v60 = vpop.eup %6228  ;;  %6010 = vmatpush3.bf16.msra.mxu1 %v6669_v20  ;;  %5578 = vmatprep.mubr.msk.f32.mxu1 %vm1458_vm5, %v1541_v59 }
 0x3e6   :  { %v6231_v61 = vpop.eup %6230  ;;  %v1542_v62 = vmul.f32 %v6229_v60, %v6213_v34  ;;  %6012 = vmatprep.subr.bf16.mxu1 %v6687_v36  ;;  %v2258_v60 = vld [vmem:[%s7318_s6 + $0x8] sm:$0xff] }
 0x3e7   :  { %v1543_v63 = vmul.f32 %v6231_v61, %v6215_v35 }
 0x3e8   :  { %5579 = vmatmul.mubr.msk.f32.vlgmr.msra.gmra.mrb[18].mxu1 %vm1458_vm5, %v1542_v62  ;;  %v2259_v62 = vld [vmem:[%s7318_s6 + $0x10] sm:$0xff] }
 0x3e9   :  { %v6233_v0 = vpop.eup %6232  ;;  %6014 = vmatpush3.bf16.msra.mxu1 %v6687_v36  ;;  %5585 = vmatprep.mubr.msk.f32.mxu1 %vm1458_vm5, %v1543_v63  ;;  %v1872_v36 = vld [vmem:[%s7317_s5 + $0x8] sm:$0xff]  ;;  %v2260_v63 = vld [vmem:[%s7318_s6 + $0x18] sm:$0xff] }
 0x3ea   :  { %v6235_v1 = vpop.eup %6234  ;;  %v1544_v2 = vmul.f32 %v6233_v0, %v6217_v39  ;;  %5595 = vmatprep.subr.mxu1 %v1871_v5  ;;  %5600 = vmatprep.subr.mxu0 %v1872_v36  ;;  %v6023_v0 = vpack.c.bf16 %v2260_v63, %v2259_v62  ;;  %v4981_v62 = vld [vmem:[%s7315_s3 + $0x1c0] sm:$0xff] }
 0x3eb   :  { %v1545_v3 = vmul.f32 %v6235_v1, %v6219_v40  ;;  %v2347_v1 = vld [vmem:[%s7319_s7] sm:$0xff] }
 0x3ec   :  { %5586 = vmatmul.mubr.msk.f32.vlgmr.msra.gmra.mrb[20].mxu1 %vm1458_vm5, %v1544_v2  ;;  %v2348_v2 = vld [vmem:[%s7319_s7 + $0x8] sm:$0xff] }
 0x3ed   :  { %v6237_v20 = vpop.eup %6236  ;;  %5592 = vmatprep.mubr.msk.f32.mxu0 %vm1458_vm5, %v1545_v3  ;;  %5596 = vmatpush3.msra.mxu1 %v1871_v5  ;;  %v2349_v3 = vld [vmem:[%s7319_s7 + $0x10] sm:$0xff] }
 0x3ee   :  { %v1546_v4 = vmul.f32 %v6237_v20, %v6221_v44  ;;  %5605 = vmatprep.subr.mxu1 %v1873_v6  ;;  %v6027_v20 = vpack.c.bf16 %v2348_v2, %v2347_v1  ;;  %v4975_v2 = vld [vmem:[%s7315_s3 + $0x190] sm:$0xff] }
 0x3f0   :  { %5593 = vmatmul.mubr.msk.f32.vlgmr.msra.gmra.mrb[18].mxu0 %vm1458_vm5, %v1546_v4  ;;  %v2350_v4 = vld [vmem:[%s7319_s7 + $0x18] sm:$0xff] }
 0x3f1   :  { %5601 = vmatpush3.msra.mxu0 %v1872_v36  ;;  %v6031_v5 = vpack.c.bf16 %v2350_v4, %v2349_v3  ;;  %v2351_v36 = vld [vmem:[%s7319_s7 + $0x20] sm:$0xff]  ;;  %v4976_v3 = vld [vmem:[%s7315_s3 + $0x198] sm:$0xff] }
 0x3f2   :  { %5610 = vmatprep.subr.mxu0 %v1874_v7  ;;  %v6047_v4 = vpack.c.bf16 %v4976_v3, %v4975_v2  ;;  %v5046_v2 = vld [vmem:[%s7315_s3 + $0x2c8] sm:$0xff] }
 0x4b7   :  { %v5573_v8 = vpop.f32.mrb[16].mxu1 }
 0x4b8   :  { %v1619_v9 = vpop.f32.mrb[17].mxu1 }
 0x4b9   :  { %5597 = vmatprep.mubr.msk.f32.mxu1 %vm1109_vm3, %v1619_v9 }
 0x4ba   :  { %5598 = vmatmul.mubr.msk.f32.vlgmr.msra.gmra.mrb[22].mxu1 %vm1109_vm3, %v5573_v8 }
 0x4bb   :  { %v5580_v10 = vpop.f32.mrb[18].mxu1  ;;  %5606 = vmatpush3.msra.mxu1 %v1873_v6  ;;  %v2352_v6 = vld [vmem:[%s7319_s7 + $0x28] sm:$0xff] }
 0x4bc   :  { %v1700_v11 = vpop.f32.mrb[19].mxu1 }
 0x4bd   :  { %5602 = vmatprep.mubr.msk.f32.mxu0 %vm1109_vm3, %v1700_v11 }
 0x4be   :  { %5603 = vmatmul.mubr.msk.f32.vlgmr.msra.gmra.mrb[20].mxu0 %vm1109_vm3, %v5580_v10 }
 0x4bf   :  { %v5587_v12 = vpop.f32.mrb[20].mxu1  ;;  %5611 = vmatpush3.msra.mxu0 %v1874_v7  ;;  %v6035_v7 = vpack.c.bf16 %v2352_v6, %v2351_v36  ;;  %v4977_v6 = vld [vmem:[%s7315_s3 + $0x1a0] sm:$0xff] }
 0x4c0   :  { %v1781_v13 = vpop.f32.mrb[21].mxu1  ;;  %6028 = vmatprep.subr.bf16.mxu0 %v6027_v20 }
 0x4c1   :  { %5607 = vmatprep.mubr.msk.f32.mxu1 %vm1109_vm3, %v1781_v13 }
 0x4c2   :  { %5608 = vmatmul.mubr.msk.f32.vlgmr.msra.gmra.mrb[24].mxu1 %vm1109_vm3, %v5587_v12 }
 0x4c3   :  { %v5594_v14 = vpop.f32.mrb[18].mxu0 }
 0x4c4   :  { %v1862_v15 = vpop.f32.mrb[19].mxu0 }
 0x4c5   :  { %5612 = vmatprep.mubr.msk.f32.mxu0 %vm1109_vm3, %v1862_v15  ;;  %v4958_v15 = vld [vmem:[%s7320_s8 + $0x28] sm:$0xff] }
 0x4c6   :  { %5613 = vmatmul.mubr.msk.f32.vlgmr.msra.gmra.mrb[22].mxu0 %vm1109_vm3, %v5594_v14 }
 0x4c7   :  { %6030 = vmatpush3.bf16.msra.mxu0 %v6027_v20  ;;  %v4983_v20 = vld [vmem:[%s7315_s3 + $0x1d0] sm:$0xff] }
 0x4c8   :  { %6032 = vmatprep.subr.bf16.mxu0 %v6031_v5 }
 0x4cb   :  { %6034 = vmatpush3.bf16.msra.mxu0 %v6031_v5  ;;  %v4984_v5 = vld [vmem:[%s7315_s3 + $0x1d8] sm:$0xff] }
 0x4cc   :  { %6036 = vmatprep.subr.bf16.mxu0 %v6035_v7  ;;  %v6063_v36 = vpack.c.bf16 %v4984_v5, %v4983_v20  ;;  %v5020_v5 = vld [vmem:[%s7315_s3 + $0x278] sm:$0xff] }
 0x4cf   :  { %6038 = vmatpush3.bf16.msra.mxu0 %v6035_v7  ;;  %v4978_v7 = vld [vmem:[%s7315_s3 + $0x1a8] sm:$0xff] }
 0x58d   :  { %v5599_v16 = vpop.f32.mrb[22].mxu1 }
 0x58e   :  { %v1947_v17 = vpop.f32.mrb[23].mxu1  ;;  %v2206_v19 = vsel %vm150_vm2, %v5599_v16, 0.0 }
 0x58f   :  { %v2199_v23 = vsel %vm150_vm2, %v1947_v17, 0.0 }
 0x591   :  { %v5604_v18 = vpop.f32.mrb[20].mxu0 }
 0x592   :  { %v2207_v21 = vsel %vm150_vm2, %v5604_v18, 0.0  ;;  %v2028_v22 = vpop.f32.mrb[21].mxu0  ;;  %v4957_v18 = vld [vmem:[%s7320_s8 + $0x20] sm:$0xff] }
 0x593   :  { %v2208_v24 = vadd.f32 %v2207_v21, %v2206_v19  ;;  %v2200_v25 = vsel %vm150_vm2, %v2028_v22, 0.0  ;;  %v4959_v21 = vld [vmem:[%s7320_s8 + $0x30] sm:$0xff] }
 0x594   :  { %v2201_v26 = vadd.f32 %v2200_v25, %v2199_v23 }
 0x595   :  { %v5609_v27 = vpop.f32.mrb[24].mxu1 }
 0x596   :  { %v2209_v28 = vsel %vm150_vm2, %v5609_v27, 0.0  ;;  %v2109_v31 = vpop.f32.mrb[25].mxu1  ;;  %v2353_v27 = vld [vmem:[%s7319_s7 + $0x30] sm:$0xff] }
 0x597   :  { %v2210_v32 = vadd.f32 %v2209_v28, %v2208_v24  ;;  %v2202_v33 = vsel %vm150_vm2, %v2109_v31, 0.0  ;;  %v4960_v24 = vld [vmem:[%s7320_s8 + $0x38] sm:$0xff] }
 0x598   :  { %v2203_v34 = vadd.f32 %v2202_v33, %v2201_v26  ;;  %v2354_v28 = vld [vmem:[%s7319_s7 + $0x38] sm:$0xff]  ;;  %v4961_v33 = vld [vmem:[%s7320_s8 + $0x40] sm:$0xff] }
 0x599   :  { %v5614_v35 = vpop.f32.mrb[22].mxu0  ;;  %v6039_v31 = vpack.c.bf16 %v2354_v28, %v2353_v27  ;;  %v4972_v27 = vld [vmem:[%s7320_s8 + $0x78] sm:$0xff] }
 0x59a   :  { %v2211_v37 = vsel %vm150_vm2, %v5614_v35, 0.0  ;;  %v2190_v39 = vpop.f32.mrb[23].mxu0 }
 0x59b   :  { %v2212_v40 = vadd.f32 %v2211_v37, %v2210_v32  ;;  %v2204_v41 = vsel %vm150_vm2, %v2190_v39, 0.0  ;;  %6040 = vmatprep.subr.bf16.mxu0 %v6039_v31  ;;  %v4962_v32 = vld [vmem:[%s7320_s8 + $0x48] sm:$0xff] }
 0x59c   :  { %v2205_v44 = vadd.f32 %v2204_v41, %v2203_v34  ;;  %6042 = vmatpush3.bf16.msra.mxu0 %v6039_v31  ;;  %v4966_v41 = vld [vmem:[%s7320_s8 + $0x58] sm:$0xff]  ;;  %v4979_v31 = vld [vmem:[%s7315_s3 + $0x1b0] sm:$0xff] }
 0x59d   :  { %v2217_v45 = vadd.f32 %v4956_v38, %v2212_v40 }
 0x59e   :  { %v2216_v46 = vadd.f32 %v4955_v42, %v2205_v44  ;;  %v4965_v42 = vld [vmem:[%s7320_s8 + $0x50] sm:$0xff] }
 0x59f   :  { %v2219_v47 = vadd.f32 %v2217_v45, %v6430_v30 }
 0x5a0   :  { %v2218_v48 = vadd.f32 %v2216_v46, %v6428_v29  ;;  %v2257_v29 = vld [vmem:[%s7318_s6] sm:$0xff] }
 0x5a1   :  { %v2229_v49 = vsel %vm150_vm2, %v2219_v47, 0.0  ;;  %v6019_v61 = vpack.c.bf16 %v2258_v60, %v2257_v29  ;;  %v4973_v60 = vld [vmem:[%s7315_s3 + $0x180] sm:$0xff] }
 0x5a2   :  { %2230 = vadd.xlane.f32.xlu1 %v2229_v49  ;;  %v2226_v50 = vsel %vm150_vm2, %v2218_v48, 0.0 }
 0x5a3   :  { %2227 = vadd.xlane.f32.xlu0 %v2226_v50  ;;  %6020 = vmatprep.subr.bf16.mxu1 %v6019_v61 }
 0x5a4   :  { %6022 = vmatpush3.bf16.msra.mxu1 %v6019_v61  ;;  %v4974_v61 = vld [vmem:[%s7315_s3 + $0x188] sm:$0xff] }
 0x5a5   :  { %6024 = vmatprep.subr.bf16.mxu1 %v6023_v0  ;;  %v6043_v63 = vpack.c.bf16 %v4974_v61, %v4973_v60  ;;  %v5040_v60 = vld [vmem:[%s7315_s3 + $0x298] sm:$0xff] }
 0x5a8   :  { %6026 = vmatpush3.bf16.msra.mxu1 %v6023_v0  ;;  %v4982_v0 = vld [vmem:[%s7315_s3 + $0x1c8] sm:$0xff] }
 0x5a9   :  { %v6059_v1 = vpack.c.bf16 %v4982_v0, %v4981_v62  ;;  %6044 = vmatprep.subr.bf16.mxu1 %v6043_v63  ;;  %v5017_v62 = vld [vmem:[%s7315_s3 + $0x260] sm:$0xff] }
 0x5ab   :  { %6060 = vmatprep.subr.bf16.mxu0 %v6059_v1 }
 0x62f   :  { %v2231_v51 = vpop.xlane.xlu1 %2230 }
 0x630   :  { %v2234_v52 = vmul.f32 0.03125, %v2231_v51  ;;  %v2228_v53 = vpop.xlane.xlu0 %2227 }
 0x631   :  { %v2233_v54 = vmul.f32 0.03125, %v2228_v53 }
 0x632   :  { %v2236_v55 = vsub.f32 %v2219_v47, %v2234_v52 }
 0x633   :  { %v2235_v56 = vsub.f32 %v2218_v48, %v2233_v54 }
 0x634   :  { %v2238_v57 = vmul.f32 %v2236_v55, %v2236_v55 }
 0x635   :  { %v2237_v58 = vmul.f32 %v2235_v56, %v2235_v56 }
 0x636   :  { %v2242_v59 = vsel %vm150_vm2, %v2238_v57, 0.0 }
 0x637   :  { %2243 = vadd.xlane.f32.xlu1 %v2242_v59  ;;  %v2239_v30 = vsel %vm150_vm2, %v2237_v58, 0.0 }
 0x638   :  { %2240 = vadd.xlane.f32.xlu0 %v2239_v30 }
 0x6c4   :  { %v2244_v8 = vpop.xlane.xlu1 %2243 }
 0x6c5   :  { %v2246_v9 = vmul.f32 0.03125, %v2244_v8  ;;  %v2241_v10 = vpop.xlane.xlu0 %2240  ;;  %v5005_v8 = vld [vmem:[%s7315_s3 + $0x200] sm:$0xff] }
 0x6c6   :  { %v2245_v11 = vmul.f32 0.03125, %v2241_v10  ;;  %v5006_v10 = vld [vmem:[%s7315_s3 + $0x208] sm:$0xff] }
 0x6c7   :  { %v2248_v12 = vadd.f32 1e-05, %v2246_v9  ;;  %v6051_v9 = vpack.c.bf16 %v4978_v7, %v4977_v6  ;;  %v5048_v6 = vld [vmem:[%s7315_s3 + $0x2d8] sm:$0xff] }
 0x6c8   :  { %v2247_v13 = vadd.f32 1e-05, %v2245_v11  ;;  %v6075_v11 = vpack.c.bf16 %v5006_v10, %v5005_v8  ;;  %v5041_v8 = vld [vmem:[%s7315_s3 + $0x2a0] sm:$0xff] }
 0x6c9   :  { %6238 = vrsqrt.f32 %v2248_v12 }
 0x6ca   :  { %6240 = vrsqrt.f32 %v2247_v13 }
 0x6d3   :  { %v6239_v14 = vpop.eup %6238 }
 0x6d4   :  { %v6241_v16 = vpop.eup %6240  ;;  %v2252_v17 = vmul.f32 %v6239_v14, %v2236_v55 }
 0x6d5   :  { %v2251_v19 = vmul.f32 %v6241_v16, %v2235_v56 }
 0x6d6   :  { %v2254_v22 = vmul.f32 %v4958_v15, %v2252_v17 }
 0x6d7   :  { %v2253_v23 = vmul.f32 %v4957_v18, %v2251_v19  ;;  %v4970_v19 = vld [vmem:[%s7320_s8 + $0x68] sm:$0xff] }
 0x6d8   :  { %v2256_v26 = vadd.f32 %v4960_v24, %v2254_v22 }
 0x6d9   :  { %v2255_v25 = vadd.f32 %v4959_v21, %v2253_v23  ;;  %v4969_v23 = vld [vmem:[%s7320_s8 + $0x60] sm:$0xff] }
 0x6db   :  { %5623 = vmatprep.mubr.msk.f32.mxu1 %vm150_vm2, %v2255_v25 }
 0x6dc   :  { %5624 = vmatmul.mubr.msk.f32.vlgmr.msra.gmra.mrb[26].mxu1 %vm150_vm2, %v2256_v26 }
 0x6dd   :  { %6046 = vmatpush3.bf16.msra.mxu1 %v6043_v63  ;;  %v5018_v63 = vld [vmem:[%s7315_s3 + $0x268] sm:$0xff] }
 0x6de   :  { %6048 = vmatprep.subr.bf16.mxu1 %v6047_v4  ;;  %v6099_v3 = vpack.c.bf16 %v5018_v63, %v5017_v62 }
 0x6e1   :  { %6050 = vmatpush3.bf16.msra.mxu1 %v6047_v4  ;;  %v5019_v4 = vld [vmem:[%s7315_s3 + $0x270] sm:$0xff] }
 0x6e2   :  { %6052 = vmatprep.subr.bf16.mxu1 %v6051_v9  ;;  %v6103_v7 = vpack.c.bf16 %v5020_v5, %v5019_v4 }
 0x7af   :  { %v5625_v34 = vpop.f32.mrb[26].mxu1 }
 0x7b0   :  { %v2342_v35 = vadd.f32 %v5625_v34, %v4962_v32  ;;  %v2336_v37 = vpop.f32.mrb[27].mxu1  ;;  %v4980_v32 = vld [vmem:[%s7315_s3 + $0x1b8] sm:$0xff] }
 0x7b1   :  { %v2337_v38 = vadd.f32 %v4961_v33, %v2336_v37  ;;  %v5007_v33 = vld [vmem:[%s7315_s3 + $0x210] sm:$0xff]  ;;  %v5008_v34 = vld [vmem:[%s7315_s3 + $0x218] sm:$0xff] }
 0x7b2   :  { %v2346_v40 = vmax.f32 %v2342_v35, 0.0 }
 0x7b3   :  { %v2345_v39 = vmax.f32 %v2337_v38, 0.0  ;;  %v4985_v38 = vld [vmem:[%s7315_s3 + $0x1e0] sm:$0xff] }
 0x7b5   :  { %5642 = vmatprep.mubr.msk.f32.mxu0 %vm2358_vm6, %v2345_v39  ;;  %v6055_v39 = vpack.c.bf16 %v4980_v32, %v4979_v31  ;;  %v4991_v31 = vld [vmem:[%s7316_s4 + $0xd0] sm:$0xff]  ;;  %v5021_v32 = vld [vmem:[%s7316_s4 + $0x100] sm:$0xff] }
 0x7b6   :  { %5643 = vmatmul.mubr.msk.f32.vlgmr.msra.gmra.mrb[24].mxu0 %vm2358_vm6, %v2346_v40  ;;  %v6079_v40 = vpack.c.bf16 %v5008_v34, %v5007_v33 }
 0x7b7   :  { %6062 = vmatpush3.bf16.msra.mxu0 %v6059_v1  ;;  %v5045_v1 = vld [vmem:[%s7315_s3 + $0x2c0] sm:$0xff] }
 0x7b8   :  { %6064 = vmatprep.subr.bf16.mxu0 %v6063_v36  ;;  %v6123_v20 = vpack.c.bf16 %v5046_v2, %v5045_v1 }
 0x7bb   :  { %6066 = vmatpush3.bf16.msra.mxu0 %v6063_v36  ;;  %v5047_v36 = vld [vmem:[%s7315_s3 + $0x2d0] sm:$0xff] }
 0x7bc   :  { %6076 = vmatprep.subr.bf16.mxu0 %v6075_v11  ;;  %v6127_v10 = vpack.c.bf16 %v5048_v6, %v5047_v36  ;;  %v5028_v6 = vld [vmem:[%s7316_s4 + $0x138] sm:$0xff] }
 0x889   :  { %v5644_v44 = vpop.f32.mrb[24].mxu0 }
 0x88a   :  { %v2437_v45 = vadd.f32 %v5644_v44, %v4966_v41  ;;  %v2431_v46 = vpop.f32.mrb[25].mxu0  ;;  %v4986_v41 = vld [vmem:[%s7315_s3 + $0x1e8] sm:$0xff] }
 0x88b   :  { %v2432_v47 = vadd.f32 %v4965_v42, %v2431_v46  ;;  %v5013_v42 = vld [vmem:[%s7315_s3 + $0x240] sm:$0xff]  ;;  %v5014_v44 = vld [vmem:[%s7315_s3 + $0x248] sm:$0xff] }
 0x88c   :  { %v2441_v48 = vadd.f32 %v2437_v45, %v2256_v26  ;;  %v4971_v26 = vld [vmem:[%s7320_s8 + $0x70] sm:$0xff]  ;;  %v6067_v45 = vpack.c.bf16 %v4986_v41, %v4985_v38  ;;  %v6091_v46 = vpack.c.bf16 %v5014_v44, %v5013_v42 }
 0x88d   :  { %v2440_v49 = vadd.f32 %v2432_v47, %v2255_v25  ;;  %v4987_v47 = vld [vmem:[%s7315_s3 + $0x1f0] sm:$0xff] }
 0x88e   :  { %v2451_v50 = vsel %vm150_vm2, %v2441_v48, 0.0 }
 0x88f   :  { %2452 = vadd.xlane.f32.xlu1 %v2451_v50  ;;  %v2448_v51 = vsel %vm150_vm2, %v2440_v49, 0.0  ;;  %v5016_v50 = vld [vmem:[%s7315_s3 + $0x258] sm:$0xff] }
 0x890   :  { %2449 = vadd.xlane.f32.xlu0 %v2448_v51 }
 0x91c   :  { %v2453_v52 = vpop.xlane.xlu1 %2452 }
 0x91d   :  { %v2455_v53 = vmul.f32 0.03125, %v2453_v52  ;;  %v2450_v54 = vpop.xlane.xlu0 %2449 }
 0x91e   :  { %v2454_v55 = vmul.f32 0.03125, %v2450_v54  ;;  %v5010_v54 = vld [vmem:[%s7315_s3 + $0x228] sm:$0xff] }
 0x91f   :  { %v2457_v56 = vsub.f32 %v2441_v48, %v2455_v53  ;;  %v4988_v48 = vld [vmem:[%s7315_s3 + $0x1f8] sm:$0xff]  ;;  %v5009_v53 = vld [vmem:[%s7315_s3 + $0x220] sm:$0xff] }
 0x920   :  { %v2456_v57 = vsub.f32 %v2440_v49, %v2454_v55  ;;  %v5015_v49 = vld [vmem:[%s7315_s3 + $0x250] sm:$0xff]  ;;  %v6071_v51 = vpack.c.bf16 %v4988_v48, %v4987_v47  ;;  %v5037_v55 = vld [vmem:[%s7315_s3 + $0x280] sm:$0xff]  ;;  %v4990_v48 = vld [vmem:[%s7316_s4 + $0xc8] sm:$0xff] }
 0x921   :  { %v2459_v58 = vmul.f32 %v2457_v56, %v2457_v56  ;;  %v6095_v52 = vpack.c.bf16 %v5016_v50, %v5015_v49  ;;  %v5025_v47 = vld [vmem:[%s7316_s4 + $0x120] sm:$0xff] }
 0x922   :  { %v2458_v59 = vmul.f32 %v2456_v57, %v2456_v57 }
 0x923   :  { %v2463_v30 = vsel %vm150_vm2, %v2459_v58, 0.0 }
 0x924   :  { %2464 = vadd.xlane.f32.xlu1 %v2463_v30  ;;  %v2460_v29 = vsel %vm150_vm2, %v2458_v59, 0.0  ;;  %v5011_v59 = vld [vmem:[%s7315_s3 + $0x230] sm:$0xff]  ;;  %v5012_v30 = vld [vmem:[%s7315_s3 + $0x238] sm:$0xff] }
 0x925   :  { %2461 = vadd.xlane.f32.xlu0 %v2460_v29  ;;  %v5039_v29 = vld [vmem:[%s7315_s3 + $0x290] sm:$0xff]  ;;  %v6087_v61 = vpack.c.bf16 %v5012_v30, %v5011_v59  ;;  %v5054_v59 = vld [vmem:[%s7316_s4 + $0x148] sm:$0xff] }
 0x926   :  { %v6111_v0 = vpack.c.bf16 %v5040_v60, %v5039_v29  ;;  %v5023_v30 = vld [vmem:[%s7316_s4 + $0x110] sm:$0xff]  ;;  %v5053_v60 = vld [vmem:[%s7316_s4 + $0x140] sm:$0xff] }
 0x9b1   :  { %v2465_v12 = vpop.xlane.xlu1 %2464 }
 0x9b2   :  { %v2467_v13 = vmul.f32 0.03125, %v2465_v12  ;;  %v2462_v14 = vpop.xlane.xlu0 %2461  ;;  %v5043_v12 = vld [vmem:[%s7315_s3 + $0x2b0] sm:$0xff] }
 0x9b3   :  { %v2466_v15 = vmul.f32 0.03125, %v2462_v14 }
 0x9b4   :  { %v2469_v16 = vadd.f32 1e-05, %v2467_v13  ;;  %v5044_v13 = vld [vmem:[%s7315_s3 + $0x2b8] sm:$0xff] }
 0x9b5   :  { %v2468_v17 = vadd.f32 1e-05, %v2466_v15  ;;  %v6119_v14 = vpack.c.bf16 %v5044_v13, %v5043_v12  ;;  %v5049_v15 = vld [vmem:[%s7315_s3 + $0x2e0] sm:$0xff] }
 0x9b6   :  { %6242 = vrsqrt.f32 %v2469_v16  ;;  %v5050_v16 = vld [vmem:[%s7315_s3 + $0x2e8] sm:$0xff] }
 0x9b7   :  { %6244 = vrsqrt.f32 %v2468_v17  ;;  %v6131_v17 = vpack.c.bf16 %v5050_v16, %v5049_v15 }
 0x9c0   :  { %v6243_v18 = vpop.eup %6242 }
 0x9c1   :  { %v6245_v21 = vpop.eup %6244  ;;  %v2473_v22 = vmul.f32 %v6243_v18, %v2457_v56  ;;  %v5038_v56 = vld [vmem:[%s7315_s3 + $0x288] sm:$0xff]  ;;  %v5051_v18 = vld [vmem:[%s7315_s3 + $0x2f0] sm:$0xff] }
 0x9c2   :  { %v2472_v24 = vmul.f32 %v6245_v21, %v2456_v57  ;;  %v6083_v57 = vpack.c.bf16 %v5010_v54, %v5009_v53  ;;  %v6107_v58 = vpack.c.bf16 %v5038_v56, %v5037_v55 }
 0x9c3   :  { %v2475_v25 = vmul.f32 %v4970_v19, %v2473_v22  ;;  %v5052_v19 = vld [vmem:[%s7315_s3 + $0x2f8] sm:$0xff]  ;;  %v4989_v22 = vld [vmem:[%s7316_s4 + $0xc0] sm:$0xff] }
 0x9c4   :  { %v2474_v28 = vmul.f32 %v4969_v23, %v2472_v24  ;;  %v6135_v21 = vpack.c.bf16 %v5052_v19, %v5051_v18  ;;  %v4995_v18 = vld [vmem:[%s7316_s4 + $0xf0] sm:$0xff] }
 0x9c5   :  { %v6892_v37 = vadd.f32 %v4972_v27, %v2475_v25 }
 0x9c6   :  { %v6890_v35 = vadd.f32 %v4971_v26, %v2474_v28  ;;  %v5022_v28 = vld [vmem:[%s7316_s4 + $0x108] sm:$0xff] }
 0x9c8   :  { %5653 = vmatprep.mubr.msk.f32.mxu1 %vm150_vm2, %v6890_v35  ;;  %5675 = vmatprep.mubr.msk.f32.mxu0 %vm150_vm2, %v6890_v35 }
 0x9c9   :  { %5654 = vmatmul.mubr.msk.f32.vlgmr.msra.gmra.mrb[28].mxu1 %vm150_vm2, %v6892_v37  ;;  %5676 = vmatmul.mubr.msk.f32.vlgmr.msra.gmra.mrb[26].mxu0 %vm150_vm2, %v6892_v37 }
 0x9ca   :  { %6054 = vmatpush3.bf16.msra.mxu1 %v6051_v9  ;;  %6078 = vmatpush3.bf16.msra.mxu0 %v6075_v11  ;;  %v5042_v9 = vld [vmem:[%s7315_s3 + $0x2a8] sm:$0xff] }
 0x9cb   :  { %5664 = vmatprep.mubr.msk.f32.mxu1 %vm150_vm2, %v6890_v35  ;;  %5697 = vmatprep.mubr.msk.f32.mxu0 %vm150_vm2, %v6890_v35  ;;  %v6115_v11 = vpack.c.bf16 %v5042_v9, %v5041_v8  ;;  %v5027_v8 = vld [vmem:[%s7316_s4 + $0x130] sm:$0xff] }
 0x9cc   :  { %6056 = vmatprep.subr.bf16.mxu1 %v6055_v39  ;;  %6080 = vmatprep.subr.bf16.mxu0 %v6079_v40 }
 0x9ce   :  { %6058 = vmatpush3.bf16.msra.mxu1 %v6055_v39  ;;  %6082 = vmatpush3.bf16.msra.mxu0 %v6079_v40 }
 0x9cf   :  { %6068 = vmatprep.subr.bf16.mxu1 %v6067_v45  ;;  %6092 = vmatprep.subr.bf16.mxu0 %v6091_v46 }
 0x9d1   :  { %5665 = vmatmul.mubr.msk.f32.vlgmr.msra.gmra.mrb[30].mxu1 %vm150_vm2, %v6892_v37  ;;  %5698 = vmatmul.mubr.msk.f32.vlgmr.msra.gmra.mrb[28].mxu0 %vm150_vm2, %v6892_v37 }
 0x9d2   :  { %6070 = vmatpush3.bf16.msra.mxu1 %v6067_v45  ;;  %5686 = vmatprep.mubr.msk.f32.mxu1 %vm150_vm2, %v6890_v35  ;;  %v5026_v45 = vld [vmem:[%s7316_s4 + $0x128] sm:$0xff] }
 0x9d3   :  { %6094 = vmatpush3.bf16.msra.mxu0 %v6091_v46  ;;  %5719 = vmatprep.mubr.msk.f32.mxu0 %vm150_vm2, %v6890_v35 }
 0x9d4   :  { %6072 = vmatprep.subr.bf16.mxu1 %v6071_v51  ;;  %6096 = vmatprep.subr.bf16.mxu0 %v6095_v52 }
 0x9d6   :  { %6074 = vmatpush3.bf16.msra.mxu1 %v6071_v51  ;;  %v4993_v51 = vld [vmem:[%s7316_s4 + $0xe0] sm:$0xff] }
 0x9d7   :  { %6098 = vmatpush3.bf16.msra.mxu0 %v6095_v52  ;;  %6084 = vmatprep.subr.bf16.mxu1 %v6083_v57 }
 0x9d8   :  { %6108 = vmatprep.subr.bf16.mxu0 %v6107_v58 }
 0x9d9   :  { %5687 = vmatmul.mubr.msk.f32.vlgmr.msra.gmra.mrb[32].mxu1 %vm150_vm2, %v6892_v37 }
 0x9da   :  { %5720 = vmatmul.mubr.msk.f32.vlgmr.msra.gmra.mrb[30].mxu0 %vm150_vm2, %v6892_v37  ;;  %6086 = vmatpush3.bf16.msra.mxu1 %v6083_v57 }
 0x9db   :  { %5708 = vmatprep.mubr.msk.f32.mxu1 %vm150_vm2, %v6890_v35  ;;  %6110 = vmatpush3.bf16.msra.mxu0 %v6107_v58  ;;  %v5024_v58 = vld [vmem:[%s7316_s4 + $0x118] sm:$0xff] }
 0x9dc   :  { %5741 = vmatprep.mubr.msk.f32.mxu0 %vm150_vm2, %v6890_v35  ;;  %6088 = vmatprep.subr.bf16.mxu1 %v6087_v61 }
 0x9dd   :  { %6112 = vmatprep.subr.bf16.mxu0 %v6111_v0 }
 0x9de   :  { %6090 = vmatpush3.bf16.msra.mxu1 %v6087_v61 }
 0x9df   :  { %6114 = vmatpush3.bf16.msra.mxu0 %v6111_v0  ;;  %6100 = vmatprep.subr.bf16.mxu1 %v6099_v3  ;;  %v4994_v0 = vld [vmem:[%s7316_s4 + $0xe8] sm:$0xff] }
 0x9e0   :  { %6124 = vmatprep.subr.bf16.mxu0 %v6123_v20 }
 0x9e1   :  { %5709 = vmatmul.mubr.msk.f32.vlgmr.msra.gmra.mrb[34].mxu1 %vm150_vm2, %v6892_v37 }
 0x9e2   :  { %5742 = vmatmul.mubr.msk.f32.vlgmr.msra.gmra.mrb[32].mxu0 %vm150_vm2, %v6892_v37  ;;  %6102 = vmatpush3.bf16.msra.mxu1 %v6099_v3 }
 0x9e3   :  { %5730 = vmatprep.mubr.msk.f32.mxu1 %vm150_vm2, %v6890_v35  ;;  %6126 = vmatpush3.bf16.msra.mxu0 %v6123_v20 }
 0x9e4   :  { %5763 = vmatprep.mubr.msk.f32.mxu0 %vm150_vm2, %v6890_v35  ;;  %6104 = vmatprep.subr.bf16.mxu1 %v6103_v7 }
 0x9e5   :  { %6128 = vmatprep.subr.bf16.mxu0 %v6127_v10 }
 0x9e6   :  { %6106 = vmatpush3.bf16.msra.mxu1 %v6103_v7  ;;  %v5058_v7 = vld [vmem:[%s7316_s4 + $0x168] sm:$0xff] }
 0x9e7   :  { %6130 = vmatpush3.bf16.msra.mxu0 %v6127_v10  ;;  %6116 = vmatprep.subr.bf16.mxu1 %v6115_v11  ;;  %v5057_v10 = vld [vmem:[%s7316_s4 + $0x160] sm:$0xff] }
 0x9e9   :  { %5731 = vmatmul.mubr.msk.f32.vlgmr.msra.gmra.mrb[36].mxu1 %vm150_vm2, %v6892_v37 }
 0x9ea   :  { %5764 = vmatmul.mubr.msk.f32.vlgmr.msra.gmra.mrb[34].mxu0 %vm150_vm2, %v6892_v37  ;;  %6118 = vmatpush3.bf16.msra.mxu1 %v6115_v11 }
 0x9eb   :  { %5752 = vmatprep.mubr.msk.f32.mxu1 %vm150_vm2, %v6890_v35  ;;  %6120 = vmatprep.subr.bf16.mxu1 %v6119_v14 }
 0x9ee   :  { %6122 = vmatpush3.bf16.msra.mxu1 %v6119_v14  ;;  %v4992_v14 = vld [vmem:[%s7316_s4 + $0xd8] sm:$0xff] }
 0x9ef   :  { %6132 = vmatprep.subr.bf16.mxu1 %v6131_v17 }
 0x9f1   :  { %5753 = vmatmul.mubr.msk.f32.vlgmr.msra.gmra.mrb[38].mxu1 %vm150_vm2, %v6892_v37 }
 0x9f2   :  { %6134 = vmatpush3.bf16.msra.mxu1 %v6131_v17  ;;  %5774 = vmatprep.mubr.msk.f32.mxu1 %vm150_vm2, %v6890_v35 }
 0x9f3   :  { %6136 = vmatprep.subr.bf16.mxu1 %v6135_v21 }
 0x9f6   :  { %6138 = vmatpush3.bf16.msra.mxu1 %v6135_v21 }
 0x9f9   :  { %5775 = vmatmul.mubr.msk.f32.vlgmr.msra.gmra.mrb[40].mxu1 %vm150_vm2, %v6892_v37 }
 0xa9c   :  { %v5655_v23 = vpop.f32.mrb[28].mxu1  ;;  %v5677_v24 = vpop.f32.mrb[26].mxu0 }
 0xa9d   :  { %v2576_v25 = vpop.f32.mrb[29].mxu1  ;;  %v2726_v26 = vpop.f32.mrb[27].mxu0  ;;  %v2582_v55 = vadd.f32 %v5655_v23, %v4990_v48  ;;  %v2732_v5 = vadd.f32 %v5677_v24, %v4994_v0 }
 0xa9e   :  { %v2577_v27 = vadd.f32 %v4989_v22, %v2576_v25  ;;  %v2727_v56 = vadd.f32 %v4993_v51, %v2726_v26  ;;  %v5056_v25 = vld [vmem:[%s7316_s4 + $0x158] sm:$0xff]  ;;  %v5055_v26 = vld [vmem:[%s7316_s4 + $0x150] sm:$0xff] }
 0xaa0   :  { %5781 = vmatprep.mubr.msk.f32.mxu0 %vm1109_vm3, %v2577_v27 }
 0xaa4   :  { %v7051_v33 = vpop.f32.mrb[30].mxu1  ;;  %v5699_v34 = vpop.f32.mrb[28].mxu0 }
 0xaa5   :  { %v2908_v38 = vadd.f32 %v5699_v34, %v5022_v28  ;;  %v2651_v39 = vpop.f32.mrb[31].mxu1  ;;  %v2902_v40 = vpop.f32.mrb[29].mxu0  ;;  %v2657_v22 = vadd.f32 %v7051_v33, %v4992_v14 }
 0xaa6   :  { %v2652_v41 = vadd.f32 %v4991_v31, %v2651_v39  ;;  %v2903_v42 = vadd.f32 %v5021_v32, %v2902_v40  ;;  %v4996_v32 = vld [vmem:[%s7316_s4 + $0xf8] sm:$0xff]  ;;  %v5059_v39 = vld [vmem:[%s7316_s4 + $0x170] sm:$0xff] }
 0xaa8   :  { %v6139_v44 = vpack.c.bf16 %v2908_v38, %v2903_v42  ;;  %5788 = vmatprep.mubr.msk.f32.mxu1 %vm1109_vm3, %v2652_v41 }
 0xaaa   :  { %6141 = vmatprep.subr.msk.bf16.mxu0 %vm6602_vm4, %v6139_v44 }
 0xaab   :  { %6144 = vmatpush3.bf16.xpose.msk.msra.mxu0 %vm6602_vm4, %v6139_v44 }
 0xaac   :  { %v7061_v46 = vpop.f32.mrb[32].mxu1 }
 0xaad   :  { %v5721_v49 = vpop.f32.mrb[30].mxu0  ;;  %v2801_v50 = vpop.f32.mrb[33].mxu1  ;;  %v2807_v38 = vadd.f32 %v7061_v46, %v4996_v32 }
 0xaae   :  { %v3058_v52 = vadd.f32 %v5721_v49, %v5026_v45  ;;  %v3052_v53 = vpop.f32.mrb[31].mxu0  ;;  %v2802_v24 = vadd.f32 %v4995_v18, %v2801_v50  ;;  %v6287_v50 = vld [vmem:[%s7313_s1] sm:$0xff] }
 0xaaf   :  { %v3053_v54 = vadd.f32 %v5025_v47, %v3052_v53  ;;  %v6286_v47 = vld [vmem:[%s7313_s1 + $0x8] sm:$0xff] }
 0xab1   :  { %v6151_v57 = vpack.c.bf16 %v3058_v52, %v3053_v54 }
 0xab2   :  { %5782 = vmatmul.mubr.msk.f32.vlgmr.msra.gmra.mrb[36].mxu0 %vm1109_vm3, %v2582_v55 }
 0xab3   :  { %6153 = vmatprep.subr.msk.bf16.mxu0 %vm6602_vm4, %v6151_v57  ;;  %5795 = vmatprep.mubr.msk.f32.mxu0 %vm1109_vm3, %v2727_v56 }
 0xab4   :  { %6156 = vmatpush3.bf16.xpose.msk.msra.mxu0 %vm6602_vm4, %v6151_v57  ;;  %v5710_v29 = vpop.f32.mrb[34].mxu1 }
 0xab5   :  { %v2983_v61 = vadd.f32 %v5710_v29, %v5024_v58  ;;  %v5743_v62 = vpop.f32.mrb[32].mxu0  ;;  %v2977_v63 = vpop.f32.mrb[35].mxu1 }
 0xab6   :  { %v3234_v1 = vadd.f32 %v5743_v62, %v5054_v59  ;;  %v2978_v2 = vadd.f32 %v5023_v30, %v2977_v63  ;;  %v3228_v3 = vpop.f32.mrb[33].mxu0 }
 0xab7   :  { %v3229_v20 = vadd.f32 %v5053_v60, %v3228_v3 }
 0xab8   :  { %v6145_v4 = vpack.c.bf16 %v2983_v61, %v2978_v2 }
 0xab9   :  { %v6163_v36 = vpack.c.bf16 %v3234_v1, %v3229_v20 }
 0xaba   :  { %6147 = vmatprep.subr.msk.bf16.mxu1 %vm6602_vm4, %v6145_v4 }
 0xabb   :  { %5796 = vmatmul.mubr.msk.f32.vlgmr.msra.gmra.mrb[38].mxu0 %vm1109_vm3, %v2732_v5  ;;  %6164 = vmatprep.subr.bf16.mxu0 %v6163_v36 }
 0xabc   :  { %6150 = vmatpush3.bf16.xpose.msk.msra.mxu1 %vm6602_vm4, %v6145_v4  ;;  %6166 = vmatpush3.bf16.msra.mxu0 %v6163_v36  ;;  %v5732_v9 = vpop.f32.mrb[36].mxu1 }
 0xabd   :  { %v3133_v11 = vadd.f32 %v5732_v9, %v5028_v6  ;;  %v5765_v12 = vpop.f32.mrb[34].mxu0  ;;  %v3127_v13 = vpop.f32.mrb[37].mxu1 }
 0xabe   :  { %v3384_v15 = vadd.f32 %v5765_v12, %v5058_v7  ;;  %v3128_v16 = vadd.f32 %v5027_v8, %v3127_v13  ;;  %v3378_v17 = vpop.f32.mrb[35].mxu0 }
 0xabf   :  { %v3379_v19 = vadd.f32 %v5057_v10, %v3378_v17 }
 0xac0   :  { %v6157_v21 = vpack.c.bf16 %v3133_v11, %v3128_v16 }
 0xac1   :  { %v6171_v23 = vpack.c.bf16 %v3384_v15, %v3379_v19 }
 0xac2   :  { %6159 = vmatprep.subr.msk.bf16.mxu1 %vm6602_vm4, %v6157_v21 }
 0xac3   :  { %5789 = vmatmul.mubr.msk.f32.vlgmr.msra.gmra.mrb[42].mxu1 %vm1109_vm3, %v2657_v22 }
 0xac4   :  { %6162 = vmatpush3.bf16.xpose.msk.msra.mxu1 %vm6602_vm4, %v6157_v21  ;;  %5802 = vmatprep.mubr.msk.f32.mxu1 %vm1109_vm3, %v2802_v24  ;;  %v5754_v27 = vpop.f32.mrb[38].mxu1 }
 0xac5   :  { %v3309_v28 = vadd.f32 %v5754_v27, %v5056_v25  ;;  %6172 = vmatprep.subr.bf16.mxu1 %v6171_v23  ;;  %v3303_v31 = vpop.f32.mrb[39].mxu1 }
 0xac6   :  { %v3304_v33 = vadd.f32 %v5055_v26, %v3303_v31 }
 0xac8   :  { %v7132_v34 = vpack.c.bf16 %v3309_v28, %v3304_v33 }
 0xaca   :  { %6168 = vmatprep.subr.bf16.mxu0 %v7132_v34 }
 0xacb   :  { %5803 = vmatmul.mubr.msk.f32.vlgmr.msra.gmra.mrb[44].mxu1 %vm1109_vm3, %v2807_v38 }
 0xacc   :  { %6174 = vmatpush3.bf16.msra.mxu1 %v6171_v23  ;;  %v5776_v40 = vpop.f32.mrb[40].mxu1 }
 0xacd   :  { %v3459_v41 = vadd.f32 %v5776_v40, %v5060_v43  ;;  %v3453_v42 = vpop.f32.mrb[41].mxu1 }
 0xace   :  { %v3454_v44 = vadd.f32 %v5059_v39, %v3453_v42 }
 0xad0   :  { %v7143_v45 = vpack.c.bf16 %v3459_v41, %v3454_v44 }
 0xb85   :  { %v5783_v46 = vpop.f32.mrb[36].mxu0 }
 0xb86   :  { %v3546_v48 = vadd.f32 %v6286_v47, %v5783_v46  ;;  %v3540_v49 = vpop.f32.mrb[37].mxu0 }
 0xb87   :  { %v3541_v51 = vadd.f32 %v6287_v50, %v3540_v49 }
 0xb88   :  { %v3813_v52 = vsel %vm1458_vm5, %v3546_v48, -inf }
 0xb89   :  { %3814 = vmax.xlane.f32.xlu1 %v3813_v52  ;;  %v3810_v53 = vsel %vm1458_vm5, %v3541_v51, -inf }
 0xb8a   :  { %3811 = vmax.xlane.f32.xlu0 %v3810_v53 }
 0xb8e   :  { %v5797_v54 = vpop.f32.mrb[38].mxu0 }
 0xb8f   :  { %v3720_v55 = vadd.f32 %v6286_v47, %v5797_v54  ;;  %v3714_v56 = vpop.f32.mrb[39].mxu0 }
 0xb90   :  { %v3715_v57 = vadd.f32 %v6287_v50, %v3714_v56 }
 0xb91   :  { %v3825_v58 = vsel %vm1458_vm5, %v3720_v55, -inf }
 0xb92   :  { %3826 = vmax.xlane.f32.xlu1 %v3825_v58  ;;  %v3822_v59 = vsel %vm1458_vm5, %v3715_v57, -inf }
 0xb93   :  { %3823 = vmax.xlane.f32.xlu0 %v3822_v59 }
 0xb96   :  { %v5790_v30 = vpop.f32.mrb[42].mxu1 }
 0xb97   :  { %v3633_v29 = vadd.f32 %v6286_v47, %v5790_v30  ;;  %v3627_v60 = vpop.f32.mrb[43].mxu1 }
 0xb98   :  { %v3628_v61 = vadd.f32 %v6287_v50, %v3627_v60 }
 0xb99   :  { %v3819_v62 = vsel %vm1458_vm5, %v3633_v29, -inf }
 0xb9a   :  { %3820 = vmax.xlane.f32.xlu1 %v3819_v62  ;;  %v3816_v63 = vsel %vm1458_vm5, %v3628_v61, -inf }
 0xb9b   :  { %3817 = vmax.xlane.f32.xlu0 %v3816_v63 }
 0xb9e   :  { %v5804_v0 = vpop.f32.mrb[44].mxu1 }
 0xb9f   :  { %v3807_v1 = vadd.f32 %v6286_v47, %v5804_v0  ;;  %v3801_v2 = vpop.f32.mrb[45].mxu1 }
 0xba0   :  { %v3802_v3 = vadd.f32 %v6287_v50, %v3801_v2 }
 0xba1   :  { %v3831_v20 = vsel %vm1458_vm5, %v3807_v1, -inf }
 0xba2   :  { %3832 = vmax.xlane.f32.xlu1 %v3831_v20  ;;  %v3828_v4 = vsel %vm1458_vm5, %v3802_v3, -inf }
 0xba3   :  { %3829 = vmax.xlane.f32.xlu0 %v3828_v4 }
 0xc16   :  { %v3815_v5 = vpop.xlane.xlu1 %3814 }
 0xc17   :  { %v3835_v36 = vsub.f32 %v3546_v48, %v3815_v5  ;;  %v3812_v6 = vpop.xlane.xlu0 %3811 }
 0xc18   :  { %v3834_v7 = vsub.f32 %v3541_v51, %v3812_v6 }
 0xc19   :  { %v3844_v8 = vmul.f32 1.442695, %v3835_v36 }
 0xc1a   :  { %v3842_v9 = vmul.f32 1.442695, %v3834_v7  ;;  %v5093_v7 = vld [vmem:[%s7317_s5 + $0x20] sm:$0xff] }
 0xc1b   :  { %6246 = vpow2.f32 %v3844_v8  ;;  %5833 = vmatprep.subr.mxu1 %v5093_v7  ;;  %v5095_v8 = vld [vmem:[%s7317_s5 + $0x30] sm:$0xff] }
 0xc1c   :  { %6248 = vpow2.f32 %v3842_v9  ;;  %v5096_v9 = vld [vmem:[%s7317_s5 + $0x38] sm:$0xff] }
 0xc1f   :  { %v3827_v10 = vpop.xlane.xlu1 %3826 }
 0xc20   :  { %v3839_v11 = vsub.f32 %v3720_v55, %v3827_v10  ;;  %v3824_v12 = vpop.xlane.xlu0 %3823 }
 0xc21   :  { %v3838_v13 = vsub.f32 %v3715_v57, %v3824_v12 }
 0xc22   :  { %v3852_v14 = vmul.f32 1.442695, %v3839_v11 }
 0xc23   :  { %v3850_v15 = vmul.f32 1.442695, %v3838_v13 }
 0xc24   :  { %6250 = vpow2.f32 %v3852_v14 }
 0xc25   :  { %v6247_v16 = vpop.eup %6246  ;;  %6252 = vpow2.f32 %v3850_v15 }
 0xc26   :  { %v6249_v17 = vpop.eup %6248  ;;  %v3861_v18 = vsel %vm1458_vm5, %v6247_v16, 0.0 }
 0xc27   :  { %v3821_v19 = vpop.xlane.xlu1 %3820  ;;  %3862 = vadd.xlane.f32.xlu1 %v3861_v18  ;;  %v3858_v21 = vsel %vm1458_vm5, %v6249_v17, 0.0 }
 0xc28   :  { %v3837_v22 = vsub.f32 %v3633_v29, %v3821_v19  ;;  %v3818_v23 = vpop.xlane.xlu0 %3817  ;;  %3859 = vadd.xlane.f32.xlu0 %v3858_v21 }
 0xc29   :  { %v3836_v24 = vsub.f32 %v3628_v61, %v3818_v23 }
 0xc2a   :  { %v3848_v25 = vmul.f32 1.442695, %v3837_v22 }
 0xc2b   :  { %v3846_v26 = vmul.f32 1.442695, %v3836_v24 }
 0xc2c   :  { %6254 = vpow2.f32 %v3848_v25 }
 0xc2d   :  { %6256 = vpow2.f32 %v3846_v26 }
 0xc2e   :  { %v6251_v27 = vpop.eup %6250 }
 0xc2f   :  { %v6253_v28 = vpop.eup %6252  ;;  %v3833_v31 = vpop.xlane.xlu1 %3832  ;;  %v3873_v32 = vsel %vm1458_vm5, %v6251_v27, 0.0 }
 0xc30   :  { %v3841_v33 = vsub.f32 %v3807_v1, %v3833_v31  ;;  %3874 = vadd.xlane.f32.xlu1 %v3873_v32  ;;  %v3830_v38 = vpop.xlane.xlu0 %3829  ;;  %v3870_v43 = vsel %vm1458_vm5, %v6253_v28, 0.0 }
 0xc31   :  { %v3840_v39 = vsub.f32 %v3802_v3, %v3830_v38  ;;  %3871 = vadd.xlane.f32.xlu0 %v3870_v43 }
 0xc32   :  { %v3856_v40 = vmul.f32 1.442695, %v3841_v33 }
 0xc33   :  { %v3854_v41 = vmul.f32 1.442695, %v3840_v39 }
 0xc34   :  { %6258 = vpow2.f32 %v3856_v40 }
 0xc35   :  { %6260 = vpow2.f32 %v3854_v41 }
 0xc36   :  { %v6255_v42 = vpop.eup %6254 }
 0xc37   :  { %v6257_v44 = vpop.eup %6256  ;;  %v3867_v46 = vsel %vm1458_vm5, %v6255_v42, 0.0 }
 0xc38   :  { %3868 = vadd.xlane.f32.xlu1 %v3867_v46  ;;  %v3864_v47 = vsel %vm1458_vm5, %v6257_v44, 0.0 }
 0xc39   :  { %3865 = vadd.xlane.f32.xlu0 %v3864_v47 }
 0xc3e   :  { %v6259_v48 = vpop.eup %6258 }
 0xc3f   :  { %v6261_v49 = vpop.eup %6260  ;;  %v3879_v50 = vsel %vm1458_vm5, %v6259_v48, 0.0 }
 0xc40   :  { %3880 = vadd.xlane.f32.xlu1 %v3879_v50  ;;  %v3876_v51 = vsel %vm1458_vm5, %v6261_v49, 0.0 }
 0xc41   :  { %3877 = vadd.xlane.f32.xlu0 %v3876_v51 }
 0xcb4   :  { %v3863_v52 = vpop.xlane.xlu1 %3862 }
 0xcb5   :  { %6262 = vrcp.f32 %v3863_v52  ;;  %v3860_v53 = vpop.xlane.xlu0 %3859 }
 0xcb6   :  { %6264 = vrcp.f32 %v3860_v53 }
 0xcbd   :  { %v3875_v54 = vpop.xlane.xlu1 %3874 }
 0xcbe   :  { %6266 = vrcp.f32 %v3875_v54  ;;  %v3872_v55 = vpop.xlane.xlu0 %3871 }
 0xcbf   :  { %v6263_v56 = vpop.eup %6262  ;;  %6268 = vrcp.f32 %v3872_v55 }
 0xcc0   :  { %v6265_v57 = vpop.eup %6264  ;;  %v3891_v59 = vmul.f32 %v6263_v56, %v6247_v16 }
 0xcc1   :  { %v3890_v58 = vmul.f32 %v6265_v57, %v6249_v17 }
 0xcc3   :  { %5809 = vmatprep.mubr.msk.f32.mxu0 %vm1458_vm5, %v3890_v58 }
 0xcc4   :  { %5810 = vmatmul.mubr.msk.f32.vlgmr.msra.gmra.mrb[40].mxu0 %vm1458_vm5, %v3891_v59 }
 0xcc5   :  { %v3869_v30 = vpop.xlane.xlu1 %3868  ;;  %6170 = vmatpush3.bf16.msra.mxu0 %v7132_v34 }
 0xcc6   :  { %6270 = vrcp.f32 %v3869_v30  ;;  %6176 = vmatprep.subr.bf16.mxu0 %v7143_v45  ;;  %v3866_v29 = vpop.xlane.xlu0 %3865 }
 0xcc7   :  { %6272 = vrcp.f32 %v3866_v29 }
 0xcc8   :  { %v6267_v60 = vpop.eup %6266 }
 0xcc9   :  { %v6269_v61 = vpop.eup %6268  ;;  %v3895_v63 = vmul.f32 %v6267_v60, %v6251_v27 }
 0xcca   :  { %v3894_v62 = vmul.f32 %v6269_v61, %v6253_v28 }
 0xccc   :  { %5823 = vmatprep.mubr.msk.f32.mxu1 %vm1458_vm5, %v3894_v62 }
 0xccd   :  { %v3881_v0 = vpop.xlane.xlu1 %3880  ;;  %5824 = vmatmul.mubr.msk.f32.vlgmr.msra.gmra.mrb[46].mxu1 %vm1458_vm5, %v3895_v63  ;;  %v5112_v63 = vld [vmem:[%s7318_s6 + $0x28] sm:$0xff] }
 0xcce   :  { %6274 = vrcp.f32 %v3881_v0  ;;  %v3878_v1 = vpop.xlane.xlu0 %3877  ;;  %5834 = vmatpush3.msra.mxu1 %v5093_v7  ;;  %v5123_v7 = vld [vmem:[%s7319_s7 + $0x60] sm:$0xff] }
 0xccf   :  { %6276 = vrcp.f32 %v3878_v1  ;;  %5843 = vmatprep.subr.mxu1 %v5095_v8  ;;  %v5113_v1 = vld [vmem:[%s7318_s6 + $0x30] sm:$0xff] }
 0xcd0   :  { %v6271_v2 = vpop.eup %6270 }
 0xcd1   :  { %v6273_v3 = vpop.eup %6272  ;;  %v3893_v20 = vmul.f32 %v6271_v2, %v6255_v42  ;;  %v5106_v42 = vld [vmem:[%s7320_s8 + $0x88] sm:$0xff]  ;;  %v5114_v2 = vld [vmem:[%s7318_s6 + $0x38] sm:$0xff] }
 0xcd2   :  { %v3892_v34 = vmul.f32 %v6273_v3, %v6257_v44  ;;  %v6183_v3 = vpack.c.bf16 %v5114_v2, %v5113_v1 }
 0xcd4   :  { %5816 = vmatprep.mubr.msk.f32.mxu0 %vm1458_vm5, %v3892_v34  ;;  %v5119_v34 = vld [vmem:[%s7319_s7 + $0x40] sm:$0xff] }
 0xcd5   :  { %5817 = vmatmul.mubr.msk.f32.vlgmr.msra.gmra.mrb[42].mxu0 %vm1458_vm5, %v3893_v20  ;;  %v5120_v20 = vld [vmem:[%s7319_s7 + $0x48] sm:$0xff] }
 0xcd6   :  { %6178 = vmatpush3.bf16.msra.mxu0 %v7143_v45  ;;  %v5094_v45 = vld [vmem:[%s7317_s5 + $0x28] sm:$0xff] }
 0xcd7   :  { %5838 = vmatprep.subr.mxu0 %v5094_v45 }
 0xcd8   :  { %v6275_v4 = vpop.eup %6274 }
 0xcd9   :  { %v6277_v5 = vpop.eup %6276  ;;  %v3897_v6 = vmul.f32 %v6275_v4, %v6259_v48  ;;  %v5105_v48 = vld [vmem:[%s7320_s8 + $0x80] sm:$0xff]  ;;  %v5121_v4 = vld [vmem:[%s7319_s7 + $0x50] sm:$0xff] }
 0xcda   :  { %v3896_v36 = vmul.f32 %v6277_v5, %v6261_v49  ;;  %v6187_v5 = vpack.c.bf16 %v5120_v20, %v5119_v34  ;;  %v5132_v20 = vld [vmem:[%s7320_s8 + $0xd8] sm:$0xff] }
 0xcdc   :  { %5830 = vmatprep.mubr.msk.f32.mxu0 %vm1458_vm5, %v3896_v36  ;;  %v5122_v36 = vld [vmem:[%s7319_s7 + $0x58] sm:$0xff] }
 0xcdd   :  { %5831 = vmatmul.mubr.msk.f32.vlgmr.msra.gmra.mrb[44].mxu0 %vm1458_vm5, %v3897_v6  ;;  %v6191_v6 = vpack.c.bf16 %v5122_v36, %v5121_v4  ;;  %v5131_v36 = vld [vmem:[%s7320_s8 + $0xd0] sm:$0xff] }
 0xcde   :  { %5839 = vmatpush3.msra.mxu0 %v5094_v45 }
 0xcdf   :  { %5848 = vmatprep.subr.mxu0 %v5096_v9 }
 0xd97   :  { %v5811_v10 = vpop.f32.mrb[40].mxu0 }
 0xd98   :  { %v3970_v11 = vpop.f32.mrb[41].mxu0 }
 0xd99   :  { %5835 = vmatprep.mubr.msk.f32.mxu1 %vm1109_vm3, %v3970_v11 }
 0xd9a   :  { %5836 = vmatmul.mubr.msk.f32.vlgmr.msra.gmra.mrb[48].mxu1 %vm1109_vm3, %v5811_v10 }
 0xd9b   :  { %5844 = vmatpush3.msra.mxu1 %v5095_v8  ;;  %v5124_v8 = vld [vmem:[%s7319_s7 + $0x68] sm:$0xff] }
 0xd9c   :  { %v6195_v45 = vpack.c.bf16 %v5124_v8, %v5123_v7  ;;  %v5134_v7 = vld [vmem:[%s7320_s8 + $0xe8] sm:$0xff]  ;;  %v5133_v8 = vld [vmem:[%s7320_s8 + $0xe0] sm:$0xff] }
 0xda0   :  { %v5825_v12 = vpop.f32.mrb[46].mxu1 }
 0xda1   :  { %v4132_v13 = vpop.f32.mrb[47].mxu1 }
 0xda2   :  { %5845 = vmatprep.mubr.msk.f32.mxu1 %vm1109_vm3, %v4132_v13 }
 0xda3   :  { %5846 = vmatmul.mubr.msk.f32.vlgmr.msra.gmra.mrb[50].mxu1 %vm1109_vm3, %v5825_v12 }
 0xda8   :  { %v5818_v14 = vpop.f32.mrb[42].mxu0 }
 0xda9   :  { %v4051_v15 = vpop.f32.mrb[43].mxu0 }
 0xdaa   :  { %5840 = vmatprep.mubr.msk.f32.mxu0 %vm1109_vm3, %v4051_v15 }
 0xdab   :  { %5841 = vmatmul.mubr.msk.f32.vlgmr.msra.gmra.mrb[46].mxu0 %vm1109_vm3, %v5818_v14 }
 0xdac   :  { %5849 = vmatpush3.msra.mxu0 %v5096_v9 }
 0xdad   :  { %6188 = vmatprep.subr.bf16.mxu0 %v6187_v5 }
 0xdb0   :  { %v5832_v16 = vpop.f32.mrb[44].mxu0 }
 0xdb1   :  { %v4213_v17 = vpop.f32.mrb[45].mxu0 }
 0xdb2   :  { %5850 = vmatprep.mubr.msk.f32.mxu0 %vm1109_vm3, %v4213_v17 }
 0xdb3   :  { %5851 = vmatmul.mubr.msk.f32.vlgmr.msra.gmra.mrb[48].mxu0 %vm1109_vm3, %v5832_v16  ;;  %v5108_v16 = vld [vmem:[%s7320_s8 + $0x98] sm:$0xff] }
 0xdb4   :  { %6190 = vmatpush3.bf16.msra.mxu0 %v6187_v5 }
 0xdb5   :  { %6192 = vmatprep.subr.bf16.mxu0 %v6191_v6 }
 0xdb8   :  { %6194 = vmatpush3.bf16.msra.mxu0 %v6191_v6 }
 0xdb9   :  { %6196 = vmatprep.subr.bf16.mxu0 %v6195_v45 }
 0xdbc   :  { %6198 = vmatpush3.bf16.msra.mxu0 %v6195_v45 }
 0xe6d   :  { %v5837_v18 = vpop.f32.mrb[48].mxu1 }
 0xe6e   :  { %v4299_v19 = vpop.f32.mrb[49].mxu1  ;;  %v4558_v24 = vsel %vm150_vm2, %v5837_v18, 0.0 }
 0xe6f   :  { %v4551_v27 = vsel %vm150_vm2, %v4299_v19, 0.0  ;;  %v5107_v19 = vld [vmem:[%s7320_s8 + $0x90] sm:$0xff] }
 0xe76   :  { %v5847_v21 = vpop.f32.mrb[50].mxu1 }
 0xe77   :  { %v4461_v22 = vpop.f32.mrb[51].mxu1  ;;  %v4561_v32 = vsel %vm150_vm2, %v5847_v21, 0.0 }
 0xe78   :  { %v4554_v38 = vsel %vm150_vm2, %v4461_v22, 0.0  ;;  %v5109_v22 = vld [vmem:[%s7320_s8 + $0xa0] sm:$0xff] }
 0xe7e   :  { %v5842_v23 = vpop.f32.mrb[46].mxu0 }
 0xe7f   :  { %v4559_v25 = vsel %vm150_vm2, %v5842_v23, 0.0  ;;  %v4380_v26 = vpop.f32.mrb[47].mxu0 }
 0xe80   :  { %v4560_v28 = vadd.f32 %v4559_v25, %v4558_v24  ;;  %v4552_v31 = vsel %vm150_vm2, %v4380_v26, 0.0  ;;  %v5110_v25 = vld [vmem:[%s7320_s8 + $0xa8] sm:$0xff] }
 0xe81   :  { %v4553_v33 = vadd.f32 %v4552_v31, %v4551_v27  ;;  %v5126_v31 = vld [vmem:[%s7319_s7 + $0x78] sm:$0xff] }
 0xe82   :  { %v4562_v43 = vadd.f32 %v4561_v32, %v4560_v28  ;;  %v5125_v28 = vld [vmem:[%s7319_s7 + $0x70] sm:$0xff] }
 0xe83   :  { %v4555_v39 = vadd.f32 %v4554_v38, %v4553_v33  ;;  %v6199_v32 = vpack.c.bf16 %v5126_v31, %v5125_v28  ;;  %v5116_v33 = vld [vmem:[%s7320_s8 + $0xb8] sm:$0xff]  ;;  %v5115_v38 = vld [vmem:[%s7320_s8 + $0xb0] sm:$0xff] }
 0xe85   :  { %6200 = vmatprep.subr.bf16.mxu0 %v6199_v32 }
 0xe86   :  { %v5852_v40 = vpop.f32.mrb[48].mxu0  ;;  %6202 = vmatpush3.bf16.msra.mxu0 %v6199_v32 }
 0xe87   :  { %v4563_v41 = vsel %vm150_vm2, %v5852_v40, 0.0  ;;  %v4542_v44 = vpop.f32.mrb[49].mxu0 }
 0xe88   :  { %v4564_v46 = vadd.f32 %v4563_v41, %v4562_v43  ;;  %v4556_v47 = vsel %vm150_vm2, %v4542_v44, 0.0 }
 0xe89   :  { %v4557_v49 = vadd.f32 %v4556_v47, %v4555_v39  ;;  %v5127_v47 = vld [vmem:[%s7320_s8 + $0xc0] sm:$0xff] }
 0xe8a   :  { %v4569_v50 = vadd.f32 %v5106_v42, %v4564_v46  ;;  %v5128_v46 = vld [vmem:[%s7320_s8 + $0xc8] sm:$0xff] }
 0xe8b   :  { %v4568_v51 = vadd.f32 %v5105_v48, %v4557_v49 }
 0xe8c   :  { %v4571_v52 = vadd.f32 %v4569_v50, %v6892_v37 }
 0xe8d   :  { %v4570_v53 = vadd.f32 %v4568_v51, %v6890_v35  ;;  %v5111_v35 = vld [vmem:[%s7318_s6 + $0x20] sm:$0xff] }
 0xe8e   :  { %v4581_v54 = vsel %vm150_vm2, %v4571_v52, 0.0  ;;  %v6179_v0 = vpack.c.bf16 %v5112_v63, %v5111_v35 }
 0xe8f   :  { %4582 = vadd.xlane.f32.xlu1 %v4581_v54  ;;  %v4578_v55 = vsel %vm150_vm2, %v4570_v53, 0.0 }
 0xe90   :  { %4579 = vadd.xlane.f32.xlu0 %v4578_v55  ;;  %6180 = vmatprep.subr.bf16.mxu1 %v6179_v0 }
 0xe91   :  { %6182 = vmatpush3.bf16.msra.mxu1 %v6179_v0 }
 0xe92   :  { %6184 = vmatprep.subr.bf16.mxu1 %v6183_v3 }
 0xe95   :  { %6186 = vmatpush3.bf16.msra.mxu1 %v6183_v3 }
 0xf1c   :  { %v4583_v56 = vpop.xlane.xlu1 %4582 }
 0xf1d   :  { %v4585_v57 = vmul.f32 0.03125, %v4583_v56  ;;  %v4580_v58 = vpop.xlane.xlu0 %4579 }
 0xf1e   :  { %v4584_v59 = vmul.f32 0.03125, %v4580_v58 }
 0xf1f   :  { %v4587_v30 = vsub.f32 %v4571_v52, %v4585_v57 }
 0xf20   :  { %v4586_v29 = vsub.f32 %v4570_v53, %v4584_v59 }
 0xf21   :  { %v4589_v60 = vmul.f32 %v4587_v30, %v4587_v30 }
 0xf22   :  { %v4588_v61 = vmul.f32 %v4586_v29, %v4586_v29 }
 0xf23   :  { %v4593_v62 = vsel %vm150_vm2, %v4589_v60, 0.0 }
 0xf24   :  { %4594 = vadd.xlane.f32.xlu1 %v4593_v62  ;;  %v4590_v37 = vsel %vm150_vm2, %v4588_v61, 0.0 }
 0xf25   :  { %4591 = vadd.xlane.f32.xlu0 %v4590_v37 }
 0xfb1   :  { %v4595_v9 = vpop.xlane.xlu1 %4594 }
 0xfb2   :  { %v4597_v10 = vmul.f32 0.03125, %v4595_v9  ;;  %v4592_v11 = vpop.xlane.xlu0 %4591 }
 0xfb3   :  { %v4596_v12 = vmul.f32 0.03125, %v4592_v11 }
 0xfb4   :  { %v4599_v13 = vadd.f32 1e-05, %v4597_v10 }
 0xfb5   :  { %v4598_v14 = vadd.f32 1e-05, %v4596_v12 }
 0xfb6   :  { %6278 = vrsqrt.f32 %v4599_v13 }
 0xfb7   :  { %6280 = vrsqrt.f32 %v4598_v14 }
 0xfc0   :  { %v6279_v15 = vpop.eup %6278 }
 0xfc1   :  { %v6281_v17 = vpop.eup %6280  ;;  %v4603_v18 = vmul.f32 %v6279_v15, %v4587_v30 }
 0xfc2   :  { %v4602_v21 = vmul.f32 %v6281_v17, %v4586_v29 }
 0xfc3   :  { %v4605_v23 = vmul.f32 %v5108_v16, %v4603_v18 }
 0xfc4   :  { %v4604_v24 = vmul.f32 %v5107_v19, %v4602_v21 }
 0xfc5   :  { %v4607_v27 = vadd.f32 %v5110_v25, %v4605_v23 }
 0xfc6   :  { %v4606_v26 = vadd.f32 %v5109_v22, %v4604_v24 }
 0xfc8   :  { %5861 = vmatprep.mubr.msk.f32.mxu1 %vm150_vm2, %v4606_v26 }
 0xfc9   :  { %5862 = vmatmul.mubr.msk.f32.vlgmr.msra.gmra.mrb[52].mxu1 %vm150_vm2, %v4607_v27 }
0x109c   :  { %v5863_v43 = vpop.f32.mrb[52].mxu1 }
0x109d   :  { %v4694_v39 = vadd.f32 %v5863_v43, %v5116_v33  ;;  %v4688_v40 = vpop.f32.mrb[53].mxu1 }
0x109e   :  { %v4689_v41 = vadd.f32 %v5115_v38, %v4688_v40 }
0x109f   :  { %v4698_v44 = vmax.f32 %v4694_v39, 0.0 }
0x10a0   :  { %v4697_v42 = vmax.f32 %v4689_v41, 0.0 }
0x10a2   :  { %5880 = vmatprep.mubr.msk.f32.mxu0 %vm2358_vm6, %v4697_v42 }
0x10a3   :  { %5881 = vmatmul.mubr.msk.f32.vlgmr.msra.gmra.mrb[50].mxu0 %vm2358_vm6, %v4698_v44 }
0x1176   :  { %v5882_v48 = vpop.f32.mrb[50].mxu0 }
0x1177   :  { %v4789_v49 = vadd.f32 %v5882_v48, %v5128_v46  ;;  %v4783_v50 = vpop.f32.mrb[51].mxu0 }
0x1178   :  { %v4784_v51 = vadd.f32 %v5127_v47, %v4783_v50 }
0x1179   :  { %v4793_v52 = vadd.f32 %v4789_v49, %v4607_v27 }
0x117a   :  { %v4792_v53 = vadd.f32 %v4784_v51, %v4606_v26 }
0x117b   :  { %v4803_v54 = vsel %vm150_vm2, %v4793_v52, 0.0 }
0x117c   :  { %4804 = vadd.xlane.f32.xlu1 %v4803_v54  ;;  %v4800_v55 = vsel %vm150_vm2, %v4792_v53, 0.0 }
0x117d   :  { %4801 = vadd.xlane.f32.xlu0 %v4800_v55 }
0x1209   :  { %v4805_v56 = vpop.xlane.xlu1 %4804 }
0x120a   :  { %v4807_v57 = vmul.f32 0.03125, %v4805_v56  ;;  %v4802_v58 = vpop.xlane.xlu0 %4801 }
0x120b   :  { %v4806_v59 = vmul.f32 0.03125, %v4802_v58 }
0x120c   :  { %v4809_v30 = vsub.f32 %v4793_v52, %v4807_v57 }
0x120d   :  { %v4808_v29 = vsub.f32 %v4792_v53, %v4806_v59 }
0x120e   :  { %v4811_v60 = vmul.f32 %v4809_v30, %v4809_v30 }
0x120f   :  { %v4810_v61 = vmul.f32 %v4808_v29, %v4808_v29 }
0x1210   :  { %v4815_v62 = vsel %vm150_vm2, %v4811_v60, 0.0 }
0x1211   :  { %4816 = vadd.xlane.f32.xlu1 %v4815_v62  ;;  %v4812_v37 = vsel %vm150_vm2, %v4810_v61, 0.0 }
0x1212   :  { %4813 = vadd.xlane.f32.xlu0 %v4812_v37 }
0x129e   :  { %v4817_v35 = vpop.xlane.xlu1 %4816 }
0x129f   :  { %v4819_v63 = vmul.f32 0.03125, %v4817_v35  ;;  %v4814_v0 = vpop.xlane.xlu0 %4813 }
0x12a0   :  { %v4818_v1 = vmul.f32 0.03125, %v4814_v0 }
0x12a1   :  { %v4821_v2 = vadd.f32 1e-05, %v4819_v63 }
0x12a2   :  { %v4820_v3 = vadd.f32 1e-05, %v4818_v1 }
0x12a3   :  { %6282 = vrsqrt.f32 %v4821_v2 }
0x12a4   :  { %6284 = vrsqrt.f32 %v4820_v3 }
0x12ad   :  { %v6283_v34 = vpop.eup %6282 }
0x12ae   :  { %v6285_v4 = vpop.eup %6284  ;;  %v4825_v5 = vmul.f32 %v6283_v34, %v4809_v30 }
0x12af   :  { %v4824_v6 = vmul.f32 %v6285_v4, %v4808_v29 }
0x12b0   :  { %v4827_v45 = vmul.f32 %v5132_v20, %v4825_v5 }
0x12b1   :  { %v4826_v9 = vmul.f32 %v5131_v36, %v4824_v6 }
0x12b2   :  { %v4829_v10 = vadd.f32 %v5134_v7, %v4827_v45 }
0x12b3   :  { %v4828_v11 = vadd.f32 %v5133_v8, %v4826_v9 }
0x12b4   :  { %4831 = vst.msk [vmem:[#allocation2 + $0x8] sm:$0xff] %vm150_vm2, %v4829_v10 }
0x12b5   :  { %4830 = vst.msk [vmem:[#allocation2] sm:$0xff] %vm150_vm2, %v4828_v11 }
0x12b6   :  { %6299 = shalt.err (!%p6296_p4)
}
0x12b7   :  { %s6300_s30 = scalar_lea.hbm %s7321_s9, 256 }
0x12b8   :  { %p6301_p5 = scmp.ne.s32.totalorder %s7321_s9, %s6300_s30  ;;  %p6304_p6 = scmp.lt.u32.totalorder %s6300_s30, %s7321_s9 }
0x12ba   :  { %p6306_p7 = pnand %p6304_p6, %p6301_p5 }
0x12bc   :  { %6309 = shalt.err (!%p6306_p7)
}
0x12bd   :  { %s6313_s13 = smov 128   ;;  %s6314_s14 = smov 8  }
0x12be   :  { %4843 = dma.vmem_to_hbm [thread:$0]  %s4838_s27, 256, %s7321_s9, [#allocation3], %s6313_s13, %s6313_s13, %s6314_s14  }
0x12bf   :  { %6310 = dma.done.wait [#allocation3], 256  }
0x12c0   :  { %6311 = vsyncadd [#allocation3], 4294967040 }
0x12c1   :  { %4847 = vsyncpa [#allocation3], 1 }

</bundles_post_ra>
